<compile_context>
chip_gen: v7x
topology: tpu7x:2x2x1
jax: 0.10.0
libtpu: 0.0.40
codegen_flags: <defaults>
</compile_context>

<pallas_src>
import jax
import jax.numpy as jnp
from jax.experimental import pallas as pl
from jax.experimental.pallas import tpu as pltpu


# ----------------------------------------------------------------------------- Pallas kernel
def _make_imvgcn_kernel(num_views, n_nodes):
    """Fused kernel for the whole IMvGCN forward.

    Operand order (all bf16, full-array VMEM blocks):
        refs[0]                         : flt_f                    [N, N]
        refs[1 + 4*v .. 4 + 4*v]        : flt_v, x_v, w1_v, w2_v   (per view)
        refs[1 + 4*V + v]               : fusion weight wf_v       [d2_v, C]
    Output refs (f32):
        common [N, C], centered_0 [N, d2_0], ..., centered_{V-1} [N, d2_{V-1}]
    """
    inv_n = 1.0 / float(n_nodes)
    bf16 = jnp.bfloat16
    f32 = jnp.float32

    def kernel(*refs):
        flt_f = refs[0][...]
        view_refs = refs[1 : 1 + 4 * num_views]
        wf_refs = refs[1 + 4 * num_views : 1 + 5 * num_views]
        out_refs = refs[1 + 5 * num_views :]
        common_ref = out_refs[0]
        centered_refs = out_refs[1:]

        acc = None
        for v in range(num_views):
            flt = view_refs[4 * v][...]       # [N, N]  bf16
            x = view_refs[4 * v + 1][...]     # [N, d0] bf16
            w1 = view_refs[4 * v + 2][...]    # [d0,d1] bf16
            w2 = view_refs[4 * v + 3][...]    # [d1,d2] bf16
            wf = wf_refs[v][...]              # [d2, C] bf16

            # gc1: tanh(flt @ (x @ W1_ortho))   -- MXU dots, f32 accumulation.
            xw = jnp.dot(x, w1, preferred_element_type=f32)
            h1 = jnp.tanh(
                jnp.dot(flt, xw.astype(bf16), preferred_element_type=f32))

            # gc2: tanh(flt @ (h1 @ W2_ortho))  (dropout is identity in eval).
            hw = jnp.dot(h1.astype(bf16), w2, preferred_element_type=f32)
            h2 = jnp.tanh(
                jnp.dot(flt, hw.astype(bf16), preferred_element_type=f32))

            # FGCN row-centering folded into the gc2 epilogue
            # (f32 XLU column reduce; no padded rows can pollute the mean).
            centered = h2 - jnp.sum(h2, axis=0, keepdims=True) * inv_n
            centered_refs[v][...] = centered

            # Fusion accumulate on the freshly centered value (stays in vregs).
            d = jnp.dot(centered.astype(bf16), wf, preferred_element_type=f32)
            acc = d if acc is None else acc + d

        # FGCN output: tanh(flt_f @ sum_v centered_v @ Wf_v_ortho)
        common_ref[...] = jnp.tanh(
            jnp.dot(flt_f, acc.astype(bf16), preferred_element_type=f32))

    return kernel


# ----------------------------------------------------------------------------- plain-JAX glue
def glorot_init(key, in_dim, out_dim):
    init_range = (6.0 / (in_dim + out_dim)) ** 0.5
    return jax.random.uniform(key, (in_dim, out_dim), jnp.float32,
                              -init_range, init_range)


def ortho_norm(w):
    """W @ inv(chol(W^T W + 1e-4 I))^T via a triangular solve."""
    wtw = w.T @ w + 1e-4 * jnp.eye(w.shape[1], dtype=w.dtype)
    L = jnp.linalg.cholesky(wtw)
    # Solve L Y = W^T  =>  Y = L^{-1} W^T,  Y^T = W L^{-T}
    y = jax.scipy.linalg.solve_triangular(L, w.T, lower=True)
    return y.T


def init_imvgcn_params(key, input_dims, num_classes, layers):
    num_views = len(input_dims)
    params = {"gc1": [], "gc2": [], "fusion": []}
    hidden_dim = []
    for i in range(num_views):
        d0 = input_dims[i]
        d1 = d0 // layers[0] if d0 // layers[0] >= num_classes else num_classes
        d2 = d0 // layers[1] if d0 // layers[1] >= num_classes else num_classes
        key, k1, k2 = jax.random.split(key, 3)
        params["gc1"].append(glorot_init(k1, d0, d1))
        params["gc2"].append(glorot_init(k2, d1, d2))
        hidden_dim.append(d2)
    for i in range(num_views):
        key, kf = jax.random.split(key)
        params["fusion"].append(glorot_init(kf, hidden_dim[i], num_classes))
    return params


def imvgcn_forward(params, feature_list, flt_list, flt_f):
    num_views = len(feature_list)
    n = feature_list[0].shape[0]
    num_classes = params["fusion"][0].shape[1]

    # Tiny per-weight prep (Cholesky + triangular solve) in plain JAX.
    ow1 = [ortho_norm(w) for w in params["gc1"]]
    ow2 = [ortho_norm(w) for w in params["gc2"]]
    owf = [ortho_norm(w) for w in params["fusion"]]

    # bf16 MXU operands (halves HBM bytes for the dominant [N,N] filters).
    bf = lambda a: a.astype(jnp.bfloat16)
    operands = [bf(flt_f)]
    for i in range(num_views):
        operands += [bf(flt_list[i]), bf(feature_list[i]), bf(ow1[i]), bf(ow2[i])]
    operands += [bf(w) for w in owf]

    hidden_dims = [params["gc2"][i].shape[1] for i in range(num_views)]
    out_shape = tuple(
        [jax.ShapeDtypeStruct((n, num_classes), jnp.float32)]
        + [jax.ShapeDtypeStruct((n, d), jnp.float32) for d in hidden_dims]
    )

    vmem = pltpu.MemorySpace.VMEM
    outs = pl.pallas_call(
        _make_imvgcn_kernel(num_views, n),
        out_shape=out_shape,
        in_specs=[pl.BlockSpec(memory_space=vmem) for _ in operands],
        out_specs=tuple(pl.BlockSpec(memory_space=vmem) for _ in out_shape),
    )(*operands)

    common_feature = outs[0]
    centered_hidden = list(outs[1:])  # FGCN centers hidden_list in place.

    w_list = []
    for i in range(num_views):
        w_list.append(ow1[i])
        w_list.append(ow2[i])
    w_list += owf
    return common_feature, centered_hidden, w_list


def imvgcn_reference(params, feature_list, flt_list, flt_f):
    """Pure-JAX reference (same bf16 input rounding, f32 math) for validation."""
    num_views = len(feature_list)
    ow1 = [ortho_norm(w) for w in params["gc1"]]
    ow2 = [ortho_norm(w) for w in params["gc2"]]
    owf = [ortho_norm(w) for w in params["fusion"]]
    r = lambda a: a.astype(jnp.bfloat16).astype(jnp.float32)
    hidden = []
    for i in range(num_views):
        flt = r(flt_list[i])
        x = r(feature_list[i])
        h1 = jnp.tanh(flt @ (x @ r(ow1[i])))
        h2 = jnp.tanh(flt @ (r(h1) @ r(ow2[i])))
        hidden.append(h2 - h2.mean(axis=0, keepdims=True))
    acc = sum(r(hidden[i]) @ r(owf[i]) for i in range(num_views))
    common = jnp.tanh(r(flt_f) @ acc)
    return common, hidden


def make_norm_filter(key, n):
    """Dense symmetric-normalized adjacency standing in for the sparse flt."""
    a = (jax.random.uniform(key, (n, n)) > 0.7).astype(jnp.float32)
    a = jnp.maximum(a, a.T) + jnp.eye(n, dtype=jnp.float32)
    dinv = 1.0 / jnp.sqrt(jnp.sum(a, axis=1))
    return a * dinv[:, None] * dinv[None, :]


# ----------------------------------------------------------------------------- main
if __name__ == "__main__":
    key = jax.random.PRNGKey(0)

    N = 32                      # number of graph nodes
    input_dims = [24, 16]       # per-view feature dims
    num_classes = 4
    layers = [2, 4]             # hidden dims: view0 -> [24,12,6], view1 -> [16,8,4]

    key, kp = jax.random.split(key)
    params = init_imvgcn_params(kp, input_dims, num_classes, layers)

    feature_list, flt_list = [], []
    for d in input_dims:
        key, kf, ka = jax.random.split(key, 3)
        feature_list.append(jax.random.normal(kf, (N, d), jnp.float32))
        flt_list.append(make_norm_filter(ka, N))
    key, kff = jax.random.split(key)
    flt_f = make_norm_filter(kff, N)

    fwd = jax.jit(imvgcn_forward)
    common_feature, hidden_list, w_list = fwd(params, feature_list, flt_list, flt_f)

    jax.block_until_ready(common_feature)
    for h in hidden_list:
        jax.block_until_ready(h)
    for w in w_list:
        jax.block_until_ready(w)

    assert common_feature.shape == (N, num_classes)
    assert hidden_list[0].shape == (N, 6) and hidden_list[1].shape == (N, 4)

    # Numerical sanity check against a pure-JAX reference (bf16-rounded inputs,
    # f32 accumulation), loose tolerance to absorb MXU vs XLA accumulation order.
    ref_common, ref_hidden = jax.jit(imvgcn_reference)(
        params, feature_list, flt_list, flt_f)
    assert float(jnp.max(jnp.abs(common_feature - ref_common))) < 5e-2
    for h, rh in zip(hidden_list, ref_hidden):
        assert float(jnp.max(jnp.abs(h - rh))) < 5e-2

    print("KERNEL_OK")
</pallas_src>

<mosaic_0001>
module attributes {stable_mosaic.version = 11 : i64} {
  func.func @kernel(%arg0: memref<32x32xbf16, #tpu.memory_space<vmem>>, %arg1: memref<32x32xbf16, #tpu.memory_space<vmem>>, %arg2: memref<32x24xbf16, #tpu.memory_space<vmem>>, %arg3: memref<24x12xbf16, #tpu.memory_space<vmem>>, %arg4: memref<12x6xbf16, #tpu.memory_space<vmem>>, %arg5: memref<32x32xbf16, #tpu.memory_space<vmem>>, %arg6: memref<32x16xbf16, #tpu.memory_space<vmem>>, %arg7: memref<16x8xbf16, #tpu.memory_space<vmem>>, %arg8: memref<8x4xbf16, #tpu.memory_space<vmem>>, %arg9: memref<6x4xbf16, #tpu.memory_space<vmem>>, %arg10: memref<4x4xbf16, #tpu.memory_space<vmem>>, %arg11: memref<32x4xf32, #tpu.memory_space<vmem>>, %arg12: memref<32x6xf32, #tpu.memory_space<vmem>>, %arg13: memref<32x4xf32, #tpu.memory_space<vmem>>) attributes {dimension_semantics = [], scalar_prefetch = 0 : i64, scratch_operands = 0 : i64, tpu.core_type = #tpu.core_type<tc>} {
    %c0 = arith.constant 0 : index
    %c0_0 = arith.constant 0 : index
    %0 = vector.load %arg0[%c0, %c0_0] : memref<32x32xbf16, #tpu.memory_space<vmem>>, vector<32x32xbf16>
    %c0_1 = arith.constant 0 : index
    %c0_2 = arith.constant 0 : index
    %1 = vector.load %arg1[%c0_1, %c0_2] : memref<32x32xbf16, #tpu.memory_space<vmem>>, vector<32x32xbf16>
    %c0_3 = arith.constant 0 : index
    %c0_4 = arith.constant 0 : index
    %2 = vector.load %arg2[%c0_3, %c0_4] : memref<32x24xbf16, #tpu.memory_space<vmem>>, vector<32x24xbf16>
    %c0_5 = arith.constant 0 : index
    %c0_6 = arith.constant 0 : index
    %3 = vector.load %arg3[%c0_5, %c0_6] : memref<24x12xbf16, #tpu.memory_space<vmem>>, vector<24x12xbf16>
    %c0_7 = arith.constant 0 : index
    %c0_8 = arith.constant 0 : index
    %4 = vector.load %arg4[%c0_7, %c0_8] : memref<12x6xbf16, #tpu.memory_space<vmem>>, vector<12x6xbf16>
    %c0_9 = arith.constant 0 : index
    %c0_10 = arith.constant 0 : index
    %5 = vector.load %arg9[%c0_9, %c0_10] : memref<6x4xbf16, #tpu.memory_space<vmem>>, vector<6x4xbf16>
    %cst = arith.constant dense<0.000000e+00> : vector<32x12xf32>
    %6 = tpu.matmul %2, %3, %cst {dimension_numbers = #tpu.dot_dimension_numbers<[1], [0], [0], [1], [0, 0, 1, 1], [], []>} : vector<32x24xbf16>, vector<24x12xbf16>, vector<32x12xf32> -> vector<32x12xf32>
    %7 = arith.truncf %6 : vector<32x12xf32> to vector<32x12xbf16>
    %cst_11 = arith.constant dense<0.000000e+00> : vector<32x12xf32>
    %8 = tpu.matmul %1, %7, %cst_11 {dimension_numbers = #tpu.dot_dimension_numbers<[1], [0], [0], [1], [0, 0, 1, 1], [], []>} : vector<32x32xbf16>, vector<32x12xbf16>, vector<32x12xf32> -> vector<32x12xf32>
    %9 = math.tanh %8 : vector<32x12xf32>
    %10 = arith.truncf %9 : vector<32x12xf32> to vector<32x12xbf16>
    %cst_12 = arith.constant dense<0.000000e+00> : vector<32x6xf32>
    %11 = tpu.matmul %10, %4, %cst_12 {dimension_numbers = #tpu.dot_dimension_numbers<[1], [0], [0], [1], [0, 0, 1, 1], [], []>} : vector<32x12xbf16>, vector<12x6xbf16>, vector<32x6xf32> -> vector<32x6xf32>
    %12 = arith.truncf %11 : vector<32x6xf32> to vector<32x6xbf16>
    %cst_13 = arith.constant dense<0.000000e+00> : vector<32x6xf32>
    %13 = tpu.matmul %1, %12, %cst_13 {dimension_numbers = #tpu.dot_dimension_numbers<[1], [0], [0], [1], [0, 0, 1, 1], [], []>} : vector<32x32xbf16>, vector<32x6xbf16>, vector<32x6xf32> -> vector<32x6xf32>
    %14 = math.tanh %13 : vector<32x6xf32>
    %cst_14 = arith.constant dense<0.000000e+00> : vector<6xf32>
    %15 = vector.multi_reduction <add>, %14, %cst_14 [0] : vector<32x6xf32> to vector<6xf32>
    %16 = vector.shape_cast %15 : vector<6xf32> to vector<1x6xf32>
    %cst_15 = arith.constant 3.125000e-02 : f32
    %17 = vector.broadcast %cst_15 : f32 to vector<1x6xf32>
    %18 = arith.mulf %16, %17 : vector<1x6xf32>
    %19 = vector.broadcast %18 : vector<1x6xf32> to vector<32x6xf32>
    %20 = arith.subf %14, %19 : vector<32x6xf32>
    %c0_16 = arith.constant 0 : index
    %c0_17 = arith.constant 0 : index
    %21 = vector.load %arg12[%c0_16, %c0_17] : memref<32x6xf32, #tpu.memory_space<vmem>>, vector<32x6xf32>
    tpu.vector_store %arg12[%c0_16, %c0_17], %20 {strides = array<i32>} : memref<32x6xf32, #tpu.memory_space<vmem>>, vector<32x6xf32>,
    %22 = arith.truncf %20 : vector<32x6xf32> to vector<32x6xbf16>
    %cst_18 = arith.constant dense<0.000000e+00> : vector<32x4xf32>
    %23 = tpu.matmul %22, %5, %cst_18 {dimension_numbers = #tpu.dot_dimension_numbers<[1], [0], [0], [1], [0, 0, 1, 1], [], []>} : vector<32x6xbf16>, vector<6x4xbf16>, vector<32x4xf32> -> vector<32x4xf32>
    %c0_19 = arith.constant 0 : index
    %c0_20 = arith.constant 0 : index
    %24 = vector.load %arg5[%c0_19, %c0_20] : memref<32x32xbf16, #tpu.memory_space<vmem>>, vector<32x32xbf16>
    %c0_21 = arith.constant 0 : index
    %c0_22 = arith.constant 0 : index
    %25 = vector.load %arg6[%c0_21, %c0_22] : memref<32x16xbf16, #tpu.memory_space<vmem>>, vector<32x16xbf16>
    %c0_23 = arith.constant 0 : index
    %c0_24 = arith.constant 0 : index
    %26 = vector.load %arg7[%c0_23, %c0_24] : memref<16x8xbf16, #tpu.memory_space<vmem>>, vector<16x8xbf16>
    %c0_25 = arith.constant 0 : index
    %c0_26 = arith.constant 0 : index
    %27 = vector.load %arg8[%c0_25, %c0_26] : memref<8x4xbf16, #tpu.memory_space<vmem>>, vector<8x4xbf16>
    %c0_27 = arith.constant 0 : index
    %c0_28 = arith.constant 0 : index
    %28 = vector.load %arg10[%c0_27, %c0_28] : memref<4x4xbf16, #tpu.memory_space<vmem>>, vector<4x4xbf16>
    %cst_29 = arith.constant dense<0.000000e+00> : vector<32x8xf32>
    %29 = tpu.matmul %25, %26, %cst_29 {dimension_numbers = #tpu.dot_dimension_numbers<[1], [0], [0], [1], [0, 0, 1, 1], [], []>} : vector<32x16xbf16>, vector<16x8xbf16>, vector<32x8xf32> -> vector<32x8xf32>
    %30 = arith.truncf %29 : vector<32x8xf32> to vector<32x8xbf16>
    %cst_30 = arith.constant dense<0.000000e+00> : vector<32x8xf32>
    %31 = tpu.matmul %24, %30, %cst_30 {dimension_numbers = #tpu.dot_dimension_numbers<[1], [0], [0], [1], [0, 0, 1, 1], [], []>} : vector<32x32xbf16>, vector<32x8xbf16>, vector<32x8xf32> -> vector<32x8xf32>
    %32 = math.tanh %31 : vector<32x8xf32>
    %33 = arith.truncf %32 : vector<32x8xf32> to vector<32x8xbf16>
    %cst_31 = arith.constant dense<0.000000e+00> : vector<32x4xf32>
    %34 = tpu.matmul %33, %27, %cst_31 {dimension_numbers = #tpu.dot_dimension_numbers<[1], [0], [0], [1], [0, 0, 1, 1], [], []>} : vector<32x8xbf16>, vector<8x4xbf16>, vector<32x4xf32> -> vector<32x4xf32>
    %35 = arith.truncf %34 : vector<32x4xf32> to vector<32x4xbf16>
    %cst_32 = arith.constant dense<0.000000e+00> : vector<32x4xf32>
    %36 = tpu.matmul %24, %35, %cst_32 {dimension_numbers = #tpu.dot_dimension_numbers<[1], [0], [0], [1], [0, 0, 1, 1], [], []>} : vector<32x32xbf16>, vector<32x4xbf16>, vector<32x4xf32> -> vector<32x4xf32>
    %37 = math.tanh %36 : vector<32x4xf32>
    %cst_33 = arith.constant dense<0.000000e+00> : vector<4xf32>
    %38 = vector.multi_reduction <add>, %37, %cst_33 [0] : vector<32x4xf32> to vector<4xf32>
    %39 = vector.shape_cast %38 : vector<4xf32> to vector<1x4xf32>
    %cst_34 = arith.constant 3.125000e-02 : f32
    %40 = vector.broadcast %cst_34 : f32 to vector<1x4xf32>
    %41 = arith.mulf %39, %40 : vector<1x4xf32>
    %42 = vector.broadcast %41 : vector<1x4xf32> to vector<32x4xf32>
    %43 = arith.subf %37, %42 : vector<32x4xf32>
    %c0_35 = arith.constant 0 : index
    %c0_36 = arith.constant 0 : index
    %44 = vector.load %arg13[%c0_35, %c0_36] : memref<32x4xf32, #tpu.memory_space<vmem>>, vector<32x4xf32>
    tpu.vector_store %arg13[%c0_35, %c0_36], %43 {strides = array<i32>} : memref<32x4xf32, #tpu.memory_space<vmem>>, vector<32x4xf32>,
    %45 = arith.truncf %43 : vector<32x4xf32> to vector<32x4xbf16>
    %cst_37 = arith.constant dense<0.000000e+00> : vector<32x4xf32>
    %46 = tpu.matmul %45, %28, %cst_37 {dimension_numbers = #tpu.dot_dimension_numbers<[1], [0], [0], [1], [0, 0, 1, 1], [], []>} : vector<32x4xbf16>, vector<4x4xbf16>, vector<32x4xf32> -> vector<32x4xf32>
    %47 = arith.addf %23, %46 : vector<32x4xf32>
    %48 = arith.truncf %47 : vector<32x4xf32> to vector<32x4xbf16>
    %cst_38 = arith.constant dense<0.000000e+00> : vector<32x4xf32>
    %49 = tpu.matmul %0, %48, %cst_38 {dimension_numbers = #tpu.dot_dimension_numbers<[1], [0], [0], [1], [0, 0, 1, 1], [], []>} : vector<32x32xbf16>, vector<32x4xbf16>, vector<32x4xf32> -> vector<32x4xf32>
    %50 = math.tanh %49 : vector<32x4xf32>
    %c0_39 = arith.constant 0 : index
    %c0_40 = arith.constant 0 : index
    %51 = vector.load %arg11[%c0_39, %c0_40] : memref<32x4xf32, #tpu.memory_space<vmem>>, vector<32x4xf32>
    tpu.vector_store %arg11[%c0_39, %c0_40], %50 {strides = array<i32>} : memref<32x4xf32, #tpu.memory_space<vmem>>, vector<32x4xf32>,
    return
  }
}

</mosaic_0001>

<bundles_post_ra>
// kernel: custom-call.31
= control target key start
LH: loop header
LB: loop body
LE: loop exit
PB: predicated region body
PF: predicated region fallthrough
CT: control target
= control target key end

     0   :  { %v176_v0 = vmov 0.0   ;;  %vm38_vm0 = vcmask 7168   ;;  %vm56_vm1 = vcmask 15368   ;;  %vm73_vm2 = vcmask 1047553   ;;  %s193_s0 = inlined_call_operand.vmem [shape: f32[4,4], index: 0, kind: input, shape index: {}]   ;;  %s194_s1 = inlined_call_operand.vmem [shape: f32[4,4], index: 1, kind: output, shape index: {}]  }
   0x1   :  { %37 = vst [vmem:[#allocation2] sm:$0xff] %v176_v0  ;;  %v17_v2 = vld [vmem:[%s193_s0] sm:$0xf]  ;;  %vm74_vm3 = vmand %vm56_vm1, %vm73_vm2  ;;  %vm78_vm4 = vcmask 23568   ;;  %vm95_vm5 = vcmask 1047554   ;;  %vm100_vm7 = vcmask 31768  }
   0x2   :  { %18 = vst [vmem:[#allocation1] sm:$0xf] %v17_v2  ;;  %vm96_vm6 = vmand %vm78_vm4, %vm95_vm5  ;;  %vm117_vm8 = vcmask 1047555  }
   0x3   :  { %vm118_vm9 = vmand %vm100_vm7, %vm117_vm8 }
   0x8   :  { %v39_v1 = vld [vmem:[#allocation2] ss:$0 sm:$0xff] }
   0x9   :  { %v41_v3 = vmul.f32 %v39_v1, %v39_v1  ;;  %v48_v4 = vmul.f32 0.0, %v39_v1  ;;  %v35_v5 = vld [vmem:[#allocation1] sm:$0xf] }
   0xa   :  { %36 = vst [vmem:[#allocation0] sm:$0xf] %v35_v5 }
   0xb   :  { %42 = vadd.xlane.f32.xlu0 %v41_v3 }
   0xf   :  { %49 = vadd.xlane.f32.xlu0 %v48_v4 }
  0x11   :  { %v40_v6 = vld [vmem:[#allocation0] ss:$0 sm:$0xff]  ;;  %v60_v18 = vld [vmem:[#allocation0 + $0x1] ss:$0 sm:$0xff]  ;;  %v82_v30 = vld [vmem:[#allocation0 + $0x2] ss:$0 sm:$0xff] }
  0x12   :  { %v46_v10 = vld [vmem:[#allocation0] sm:$0xff] }
  0x13   :  { %v104_v42 = vld [vmem:[#allocation0 + $0x3] ss:$0 sm:$0xff] }
  0x98   :  { %v43_v7 = vpop.xlane.xlu0 %42 }
  0x99   :  { %v44_v8 = vsub.f32 %v40_v6, %v43_v7 }
  0x9b   :  { %168 = vrsqrt.f32 %v44_v8 }
  0x9c   :  { %v50_v9 = vpop.xlane.xlu0 %49 }
  0x9d   :  { %v51_v11 = vsub.f32 %v46_v10, %v50_v9 }
  0xa5   :  { %v169_v12 = vpop.eup %168 }
  0xa6   :  { %v52_v13 = vmul.f32 %v169_v12, %v51_v11 }
  0xa8   :  { %v53_v14 = vsel %vm38_vm0, %v52_v13, 0.0 }
  0xa9   :  { %55 = vst [vmem:[#allocation2] sm:$0xff] %v53_v14 }
  0xb0   :  { %v58_v15 = vld [vmem:[#allocation2 + $0x1] ss:$0 sm:$0xff] }
  0xb1   :  { %v61_v16 = vmul.f32 %v58_v15, %v58_v15  ;;  %v68_v17 = vmul.f32 %v58_v15, %v53_v14 }
  0xb3   :  { %62 = vadd.xlane.f32.xlu1 %v61_v16 }
  0xb7   :  { %69 = vadd.xlane.f32.xlu1 %v68_v17 }
 0x140   :  { %v63_v19 = vpop.xlane.xlu1 %62 }
 0x141   :  { %v64_v20 = vsub.f32 %v60_v18, %v63_v19 }
 0x143   :  { %170 = vrsqrt.f32 %v64_v20 }
 0x144   :  { %v70_v21 = vpop.xlane.xlu1 %69 }
 0x145   :  { %v71_v22 = vsub.f32 %v46_v10, %v70_v21 }
 0x14d   :  { %v171_v23 = vpop.eup %170 }
 0x14e   :  { %v72_v24 = vmul.f32 %v171_v23, %v71_v22 }
 0x150   :  { %v75_v25 = vsel %vm74_vm3, %v72_v24, 0.0 }
 0x151   :  { %v76_v26 = vadd.f32 %v75_v25, %v53_v14 }
 0x153   :  { %77 = vst [vmem:[#allocation2] sm:$0xff] %v76_v26 }
 0x15a   :  { %v80_v27 = vld [vmem:[#allocation2 + $0x2] ss:$0 sm:$0xff] }
 0x15b   :  { %v90_v28 = vmul.f32 %v80_v27, %v76_v26  ;;  %v83_v29 = vmul.f32 %v80_v27, %v80_v27 }
 0x15d   :  { %91 = vadd.xlane.f32.xlu1 %v90_v28  ;;  %84 = vadd.xlane.f32.xlu0 %v83_v29 }
 0x1ea   :  { %v85_v31 = vpop.xlane.xlu0 %84  ;;  %v92_v33 = vpop.xlane.xlu1 %91 }
 0x1eb   :  { %v86_v32 = vsub.f32 %v82_v30, %v85_v31  ;;  %v93_v34 = vsub.f32 %v46_v10, %v92_v33 }
 0x1ed   :  { %172 = vrsqrt.f32 %v86_v32 }
 0x1f7   :  { %v173_v35 = vpop.eup %172 }
 0x1f8   :  { %v94_v36 = vmul.f32 %v173_v35, %v93_v34 }
 0x1fa   :  { %v97_v37 = vsel %vm96_vm6, %v94_v36, 0.0 }
 0x1fb   :  { %v98_v38 = vadd.f32 %v97_v37, %v76_v26 }
 0x1fd   :  { %99 = vst [vmem:[#allocation2] sm:$0xff] %v98_v38 }
 0x204   :  { %v102_v39 = vld [vmem:[#allocation2 + $0x3] ss:$0 sm:$0xff] }
 0x205   :  { %v112_v40 = vmul.f32 %v102_v39, %v98_v38  ;;  %v105_v41 = vmul.f32 %v102_v39, %v102_v39 }
 0x207   :  { %113 = vadd.xlane.f32.xlu1 %v112_v40  ;;  %106 = vadd.xlane.f32.xlu0 %v105_v41 }
 0x294   :  { %v107_v43 = vpop.xlane.xlu0 %106  ;;  %v114_v45 = vpop.xlane.xlu1 %113 }
 0x295   :  { %v108_v44 = vsub.f32 %v104_v42, %v107_v43  ;;  %v115_v46 = vsub.f32 %v46_v10, %v114_v45 }
 0x297   :  { %174 = vrsqrt.f32 %v108_v44 }
 0x2a1   :  { %v175_v47 = vpop.eup %174 }
 0x2a2   :  { %v116_v48 = vmul.f32 %v175_v47, %v115_v46 }
 0x2a4   :  { %v119_v49 = vsel %vm118_vm9, %v116_v48, 0.0 }
 0x2a5   :  { %v120_v50 = vadd.f32 %v119_v49, %v98_v38 }
 0x2a7   :  { %121 = vst [vmem:[#allocation2] sm:$0xff] %v120_v50 }
 0x2ae   :  { %v125_v51 = vld [vmem:[#allocation2] sm:$0xf] }
 0x2af   :  { %127 = vst [vmem:[#allocation3] sm:$0xf] %v125_v51 }
 0x2b6   :  { %v143_v52 = vld [vmem:[#allocation3] sm:$0xf] }
 0x2b7   :  { %144 = vst [vmem:[%s194_s1] sm:$0xf] %v143_v52 }

// kernel: custom-call.26
= control target key start
LH: loop header
LB: loop body
LE: loop exit
PB: predicated region body
PF: predicated region fallthrough
CT: control target
= control target key end

     0   :  { %v37_v1 = vlaneseq  ;;  %v148_v11 = vmov -1.0   ;;  %s165_s0 = inlined_call_operand.vmem [shape: f32[1,4,4], index: 0, kind: input, shape index: {}]   ;;  %s166_s1 = inlined_call_operand.vmem [shape: f32[1,4,4], index: 1, kind: output, shape index: {}]  }
   0x1   :  { %v17_v0 = vld [vmem:[%s165_s0] sm:$0xf] }
   0x2   :  { %18 = vst [vmem:[#allocation1] sm:$0xf] %v17_v0  ;;  %v38_v3 = vand.u32 127, %v37_v1  ;;  %v41_v4 = vshrl.u32 %v37_v1, 7 }
   0x4   :  { %vm39_vm0 = vcmp.lt.s32.totalorder %v38_v3, 4  ;;  %vm48_vm1 = vcmp.ge.s32.totalorder %v41_v4, %v38_v3  ;;  %vm43_vm2 = vcmp.eq.s32.totalorder %v41_v4, %v38_v3  ;;  %vm62_vm4 = vcmp.eq.s32.totalorder %v38_v3, 0 }
   0x5   :  { %vm49_vm3 = vmand %vm48_vm1, %vm39_vm0  ;;  %vm59_vm5 = vcmp.eq.s32.totalorder %v38_v3, %v41_v4  ;;  %v63_v12 = vsel %vm62_vm4, 1.0, %v148_v11  ;;  %vm70_vm6 = vcmp.eq.s32.totalorder %v38_v3, 1  ;;  %vm80_vm7 = vcmp.eq.s32.totalorder %v38_v3, 2 }
   0x6   :  { %v64_v13 = vsel %vm59_vm5, %v63_v12, 0.0  ;;  %vm90_vm8 = vcmp.eq.s32.totalorder %v38_v3, 3 }
   0x9   :  { %v35_v2 = vld [vmem:[#allocation1] sm:$0xf] }
   0xa   :  { %36 = vst [vmem:[#allocation0] sm:$0xf] %v35_v2 }
  0x11   :  { %v44_v5 = vld [vmem:[#allocation0] sm:$0xff] }
  0x12   :  { %v45_v6 = vsel %vm43_vm2, %v44_v5, 0.0  ;;  %v50_v7 = vsel %vm49_vm3, %v44_v5, 0.0 }
  0x13   :  { %46 = vadd.xlane.f32.xlu0 %v45_v6 }
  0xa0   :  { %v47_v8 = vpop.xlane.xlu0 %46 }
  0xa1   :  { %146 = vrcp.f32 %v47_v8  ;;  %vm97_vm9 = vweird.f32 %v47_v8 }
  0xab   :  { %v147_v9 = vpop.eup %146 }
  0xac   :  { %v52_v10 = vmul.f32 %v147_v9, %v50_v7 }
  0xae   :  { %53 = vst [vmem:[#allocation4] sm:$0xff] %v52_v10 }
  0xb5   :  { %v66_v14 = vld [vmem:[#allocation4 + $0x1] ss:$0 sm:$0xff]  ;;  %v76_v17 = vld [vmem:[#allocation4 + $0x2] ss:$0 sm:$0xff]  ;;  %v86_v22 = vld [vmem:[#allocation4 + $0x3] ss:$0 sm:$0xff] }
  0xb6   :  { %v67_v15 = vxor.u32 2147483648, %v66_v14  ;;  %v77_v19 = vxor.u32 2147483648, %v76_v17  ;;  %v87_v24 = vxor.u32 2147483648, %v86_v22 }
  0xb8   :  { %v71_v16 = vmul.f32 %v67_v15, %v64_v13 }
  0xba   :  { %72 = vadd.xlane.f32.xlu0 %v71_v16 }
 0x147   :  { %v73_v18 = vpop.xlane.xlu0 %72 }
 0x148   :  { %v74_v20 = vsel %vm70_vm6, %v73_v18, %v64_v13 }
 0x149   :  { %v81_v21 = vmul.f32 %v77_v19, %v74_v20 }
 0x14b   :  { %82 = vadd.xlane.f32.xlu1 %v81_v21 }
 0x1d8   :  { %v83_v23 = vpop.xlane.xlu1 %82 }
 0x1d9   :  { %v84_v25 = vsel %vm80_vm7, %v83_v23, %v74_v20 }
 0x1da   :  { %v91_v26 = vmul.f32 %v87_v24, %v84_v25 }
 0x1dc   :  { %92 = vadd.xlane.f32.xlu1 %v91_v26 }
 0x269   :  { %v93_v27 = vpop.xlane.xlu1 %92 }
 0x26a   :  { %v94_v28 = vsel %vm90_vm8, %v93_v27, %v84_v25 }
 0x26b   :  { %v96_v29 = vmul.f32 %v147_v9, %v94_v28 }
 0x26d   :  { %v98_v30 = vsel %vm97_vm9, %v94_v28, %v96_v29 }
 0x26e   :  { %99 = vst [vmem:[#allocation2] sm:$0xff] %v98_v30 }
 0x275   :  { %v103_v31 = vld [vmem:[#allocation2] sm:$0xf] }
 0x276   :  { %105 = vst [vmem:[#allocation3] sm:$0xf] %v103_v31 }
 0x27d   :  { %v121_v32 = vld [vmem:[#allocation3] sm:$0xf] }
 0x27e   :  { %122 = vst [vmem:[%s166_s1] sm:$0xf] %v121_v32 }

// kernel: custom-call.22
= control target key start
LH: loop header
LB: loop body
LE: loop exit
PB: predicated region body
PF: predicated region fallthrough
CT: control target
= control target key end

     0   :  { %v216_v0 = vmov 0.0   ;;  %vm35_vm0 = vcmask 7168   ;;  %vm53_vm1 = vcmask 15368   ;;  %vm70_vm2 = vcmask 1047553   ;;  %s242_s0 = inlined_call_operand.vmem [shape: f32[6,6], index: 0, kind: input, shape index: {}]   ;;  %s243_s1 = inlined_call_operand.vmem [shape: f32[6,6], index: 1, kind: output, shape index: {}]  }
   0x1   :  { %34 = vst [vmem:[#allocation1] sm:$0xff] %v216_v0  ;;  %v230_v4 = vld [vmem:[%s242_s0] sm:$0xff]  ;;  %vm71_vm3 = vmand %vm53_vm1, %vm70_vm2  ;;  %vm75_vm4 = vcmask 23568   ;;  %vm92_vm5 = vcmask 1047554   ;;  %vm97_vm7 = vcmask 31768   ;;  %vm114_vm8 = vcmask 1047555  }
   0x2   :  { %30 = vst [vmem:[#allocation0] sm:$0xff] %v230_v4  ;;  %vm93_vm6 = vmand %vm75_vm4, %vm92_vm5  ;;  %vm119_vm10 = vcmask 39968   ;;  %vm136_vm11 = vcmask 1047556   ;;  %vm141_vm13 = vcmask 48168   ;;  %vm158_vm14 = vcmask 1047557  }
   0x3   :  { %vm115_vm9 = vmand %vm97_vm7, %vm114_vm8 }
   0x4   :  { %vm137_vm12 = vmand %vm119_vm10, %vm136_vm11 }
   0x5   :  { %vm159_vm15 = vmand %vm141_vm13, %vm158_vm14 }
   0x8   :  { %v36_v1 = vld [vmem:[#allocation1] ss:$0 sm:$0xff] }
   0x9   :  { %v38_v2 = vmul.f32 %v36_v1, %v36_v1  ;;  %v45_v3 = vmul.f32 0.0, %v36_v1  ;;  %v37_v5 = vld [vmem:[#allocation0] ss:$0 sm:$0xff]  ;;  %v57_v16 = vld [vmem:[#allocation0 + $0x1] ss:$0 sm:$0xff] }
   0xa   :  { %v79_v28 = vld [vmem:[#allocation0 + $0x2] ss:$0 sm:$0xff]  ;;  %v101_v40 = vld [vmem:[#allocation0 + $0x3] ss:$0 sm:$0xff]  ;;  %v123_v52 = vld [vmem:[#allocation0 + $0x4] ss:$0 sm:$0xff] }
   0xb   :  { %39 = vadd.xlane.f32.xlu0 %v38_v2  ;;  %v145_v0 = vld [vmem:[#allocation0 + $0x5] ss:$0 sm:$0xff] }
   0xf   :  { %46 = vadd.xlane.f32.xlu0 %v45_v3 }
  0x98   :  { %v40_v6 = vpop.xlane.xlu0 %39 }
  0x99   :  { %v41_v7 = vsub.f32 %v37_v5, %v40_v6 }
  0x9b   :  { %204 = vrsqrt.f32 %v41_v7 }
  0x9c   :  { %v47_v8 = vpop.xlane.xlu0 %46 }
  0x9d   :  { %v48_v9 = vsub.f32 %v230_v4, %v47_v8 }
  0xa5   :  { %v205_v10 = vpop.eup %204 }
  0xa6   :  { %v49_v11 = vmul.f32 %v205_v10, %v48_v9 }
  0xa8   :  { %v50_v12 = vsel %vm35_vm0, %v49_v11, 0.0 }
  0xa9   :  { %52 = vst [vmem:[#allocation1] sm:$0xff] %v50_v12 }
  0xb0   :  { %v55_v13 = vld [vmem:[#allocation1 + $0x1] ss:$0 sm:$0xff] }
  0xb1   :  { %v58_v14 = vmul.f32 %v55_v13, %v55_v13  ;;  %v65_v15 = vmul.f32 %v55_v13, %v50_v12 }
  0xb3   :  { %59 = vadd.xlane.f32.xlu1 %v58_v14 }
  0xb7   :  { %66 = vadd.xlane.f32.xlu1 %v65_v15 }
 0x140   :  { %v60_v17 = vpop.xlane.xlu1 %59 }
 0x141   :  { %v61_v18 = vsub.f32 %v57_v16, %v60_v17 }
 0x143   :  { %206 = vrsqrt.f32 %v61_v18 }
 0x144   :  { %v67_v19 = vpop.xlane.xlu1 %66 }
 0x145   :  { %v68_v20 = vsub.f32 %v230_v4, %v67_v19 }
 0x14d   :  { %v207_v21 = vpop.eup %206 }
 0x14e   :  { %v69_v22 = vmul.f32 %v207_v21, %v68_v20 }
 0x150   :  { %v72_v23 = vsel %vm71_vm3, %v69_v22, 0.0 }
 0x151   :  { %v73_v24 = vadd.f32 %v72_v23, %v50_v12 }
 0x153   :  { %74 = vst [vmem:[#allocation1] sm:$0xff] %v73_v24 }
 0x15a   :  { %v77_v25 = vld [vmem:[#allocation1 + $0x2] ss:$0 sm:$0xff] }
 0x15b   :  { %v87_v26 = vmul.f32 %v77_v25, %v73_v24  ;;  %v80_v27 = vmul.f32 %v77_v25, %v77_v25 }
 0x15d   :  { %88 = vadd.xlane.f32.xlu1 %v87_v26  ;;  %81 = vadd.xlane.f32.xlu0 %v80_v27 }
 0x1ea   :  { %v82_v29 = vpop.xlane.xlu0 %81  ;;  %v89_v31 = vpop.xlane.xlu1 %88 }
 0x1eb   :  { %v83_v30 = vsub.f32 %v79_v28, %v82_v29  ;;  %v90_v32 = vsub.f32 %v230_v4, %v89_v31 }
 0x1ed   :  { %208 = vrsqrt.f32 %v83_v30 }
 0x1f7   :  { %v209_v33 = vpop.eup %208 }
 0x1f8   :  { %v91_v34 = vmul.f32 %v209_v33, %v90_v32 }
 0x1fa   :  { %v94_v35 = vsel %vm93_vm6, %v91_v34, 0.0 }
 0x1fb   :  { %v95_v36 = vadd.f32 %v94_v35, %v73_v24 }
 0x1fd   :  { %96 = vst [vmem:[#allocation1] sm:$0xff] %v95_v36 }
 0x204   :  { %v99_v37 = vld [vmem:[#allocation1 + $0x3] ss:$0 sm:$0xff] }
 0x205   :  { %v109_v38 = vmul.f32 %v99_v37, %v95_v36  ;;  %v102_v39 = vmul.f32 %v99_v37, %v99_v37 }
 0x207   :  { %110 = vadd.xlane.f32.xlu1 %v109_v38  ;;  %103 = vadd.xlane.f32.xlu0 %v102_v39 }
 0x294   :  { %v104_v41 = vpop.xlane.xlu0 %103  ;;  %v111_v43 = vpop.xlane.xlu1 %110 }
 0x295   :  { %v105_v42 = vsub.f32 %v101_v40, %v104_v41  ;;  %v112_v44 = vsub.f32 %v230_v4, %v111_v43 }
 0x297   :  { %210 = vrsqrt.f32 %v105_v42 }
 0x2a1   :  { %v211_v45 = vpop.eup %210 }
 0x2a2   :  { %v113_v46 = vmul.f32 %v211_v45, %v112_v44 }
 0x2a4   :  { %v116_v47 = vsel %vm115_vm9, %v113_v46, 0.0 }
 0x2a5   :  { %v117_v48 = vadd.f32 %v116_v47, %v95_v36 }
 0x2a7   :  { %118 = vst [vmem:[#allocation1] sm:$0xff] %v117_v48 }
 0x2ae   :  { %v121_v49 = vld [vmem:[#allocation1 + $0x4] ss:$0 sm:$0xff] }
 0x2af   :  { %v131_v50 = vmul.f32 %v121_v49, %v117_v48  ;;  %v124_v51 = vmul.f32 %v121_v49, %v121_v49 }
 0x2b1   :  { %132 = vadd.xlane.f32.xlu1 %v131_v50  ;;  %125 = vadd.xlane.f32.xlu0 %v124_v51 }
 0x33e   :  { %v126_v53 = vpop.xlane.xlu0 %125  ;;  %v133_v55 = vpop.xlane.xlu1 %132 }
 0x33f   :  { %v127_v54 = vsub.f32 %v123_v52, %v126_v53  ;;  %v134_v56 = vsub.f32 %v230_v4, %v133_v55 }
 0x341   :  { %212 = vrsqrt.f32 %v127_v54 }
 0x34b   :  { %v213_v57 = vpop.eup %212 }
 0x34c   :  { %v135_v58 = vmul.f32 %v213_v57, %v134_v56 }
 0x34e   :  { %v138_v59 = vsel %vm137_vm12, %v135_v58, 0.0 }
 0x34f   :  { %v139_v60 = vadd.f32 %v138_v59, %v117_v48 }
 0x351   :  { %140 = vst [vmem:[#allocation1] sm:$0xff] %v139_v60 }
 0x358   :  { %v143_v61 = vld [vmem:[#allocation1 + $0x5] ss:$0 sm:$0xff] }
 0x359   :  { %v153_v62 = vmul.f32 %v143_v61, %v139_v60  ;;  %v146_v63 = vmul.f32 %v143_v61, %v143_v61 }
 0x35b   :  { %154 = vadd.xlane.f32.xlu1 %v153_v62  ;;  %147 = vadd.xlane.f32.xlu0 %v146_v63 }
 0x3e8   :  { %v148_v1 = vpop.xlane.xlu0 %147  ;;  %v155_v3 = vpop.xlane.xlu1 %154 }
 0x3e9   :  { %v149_v2 = vsub.f32 %v145_v0, %v148_v1  ;;  %v156_v5 = vsub.f32 %v230_v4, %v155_v3 }
 0x3eb   :  { %214 = vrsqrt.f32 %v149_v2 }
 0x3f5   :  { %v215_v6 = vpop.eup %214 }
 0x3f6   :  { %v157_v7 = vmul.f32 %v215_v6, %v156_v5 }
 0x3f8   :  { %v160_v8 = vsel %vm159_vm15, %v157_v7, 0.0 }
 0x3f9   :  { %v161_v9 = vadd.f32 %v160_v8, %v139_v60 }
 0x3fb   :  { %162 = vst [vmem:[#allocation1] sm:$0xff] %v161_v9  ;;  %191 = vst [vmem:[%s243_s1] sm:$0xff] %v161_v9 }

// kernel: custom-call.23
= control target key start
LH: loop header
LB: loop body
LE: loop exit
PB: predicated region body
PF: predicated region fallthrough
CT: control target
= control target key end

     0   :  { %v34_v0 = vlaneseq  ;;  %v160_v9 = vmov -1.0   ;;  %s177_s0 = inlined_call_operand.vmem [shape: f32[1,6,6], index: 0, kind: input, shape index: {}]   ;;  %s178_s1 = inlined_call_operand.vmem [shape: f32[1,6,6], index: 1, kind: output, shape index: {}]  }
   0x1   :  { %v29_v1 = vld [vmem:[%s177_s0] sm:$0xff] }
   0x2   :  { %v35_v2 = vand.u32 127, %v34_v0  ;;  %v38_v3 = vshrl.u32 %v34_v0, 7 }
   0x4   :  { %vm36_vm0 = vcmp.lt.s32.totalorder %v35_v2, 6  ;;  %vm40_vm1 = vcmp.eq.s32.totalorder %v38_v3, %v35_v2  ;;  %vm45_vm2 = vcmp.ge.s32.totalorder %v38_v3, %v35_v2  ;;  %vm59_vm4 = vcmp.eq.s32.totalorder %v35_v2, 0 }
   0x5   :  { %v42_v4 = vsel %vm40_vm1, %v29_v1, 0.0  ;;  %vm46_vm3 = vmand %vm45_vm2, %vm36_vm0  ;;  %vm56_vm5 = vcmp.eq.s32.totalorder %v35_v2, %v38_v3  ;;  %v60_v10 = vsel %vm59_vm4, 1.0, %v160_v9  ;;  %vm67_vm6 = vcmp.eq.s32.totalorder %v35_v2, 1 }
   0x6   :  { %v47_v5 = vsel %vm46_vm3, %v29_v1, 0.0  ;;  %43 = vadd.xlane.f32.xlu0 %v42_v4  ;;  %v61_v11 = vsel %vm56_vm5, %v60_v10, 0.0  ;;  %vm77_vm7 = vcmp.eq.s32.totalorder %v35_v2, 2  ;;  %vm87_vm8 = vcmp.eq.s32.totalorder %v35_v2, 3 }
   0x7   :  { %vm97_vm9 = vcmp.eq.s32.totalorder %v35_v2, 4  ;;  %vm107_vm10 = vcmp.eq.s32.totalorder %v35_v2, 5 }
  0x93   :  { %v44_v6 = vpop.xlane.xlu0 %43 }
  0x94   :  { %158 = vrcp.f32 %v44_v6  ;;  %vm114_vm11 = vweird.f32 %v44_v6 }
  0x9e   :  { %v159_v7 = vpop.eup %158 }
  0x9f   :  { %v49_v8 = vmul.f32 %v159_v7, %v47_v5 }
  0xa1   :  { %50 = vst [vmem:[#allocation2] sm:$0xff] %v49_v8 }
  0xa8   :  { %v63_v12 = vld [vmem:[#allocation2 + $0x1] ss:$0 sm:$0xff]  ;;  %v73_v15 = vld [vmem:[#allocation2 + $0x2] ss:$0 sm:$0xff]  ;;  %v83_v20 = vld [vmem:[#allocation2 + $0x3] ss:$0 sm:$0xff] }
  0xa9   :  { %v64_v13 = vxor.u32 2147483648, %v63_v12  ;;  %v74_v17 = vxor.u32 2147483648, %v73_v15  ;;  %v84_v22 = vxor.u32 2147483648, %v83_v20  ;;  %v93_v25 = vld [vmem:[#allocation2 + $0x4] ss:$0 sm:$0xff] }
  0xaa   :  { %v94_v27 = vxor.u32 2147483648, %v93_v25  ;;  %v103_v30 = vld [vmem:[#allocation2 + $0x5] ss:$0 sm:$0xff] }
  0xab   :  { %v68_v14 = vmul.f32 %v64_v13, %v61_v11  ;;  %v104_v32 = vxor.u32 2147483648, %v103_v30 }
  0xad   :  { %69 = vadd.xlane.f32.xlu0 %v68_v14 }
 0x13a   :  { %v70_v16 = vpop.xlane.xlu0 %69 }
 0x13b   :  { %v71_v18 = vsel %vm67_vm6, %v70_v16, %v61_v11 }
 0x13c   :  { %v78_v19 = vmul.f32 %v74_v17, %v71_v18 }
 0x13e   :  { %79 = vadd.xlane.f32.xlu1 %v78_v19 }
 0x1cb   :  { %v80_v21 = vpop.xlane.xlu1 %79 }
 0x1cc   :  { %v81_v23 = vsel %vm77_vm7, %v80_v21, %v71_v18 }
 0x1cd   :  { %v88_v24 = vmul.f32 %v84_v22, %v81_v23 }
 0x1cf   :  { %89 = vadd.xlane.f32.xlu1 %v88_v24 }
 0x25c   :  { %v90_v26 = vpop.xlane.xlu1 %89 }
 0x25d   :  { %v91_v28 = vsel %vm87_vm8, %v90_v26, %v81_v23 }
 0x25e   :  { %v98_v29 = vmul.f32 %v94_v27, %v91_v28 }
 0x260   :  { %99 = vadd.xlane.f32.xlu0 %v98_v29 }
 0x2ed   :  { %v100_v31 = vpop.xlane.xlu0 %99 }
 0x2ee   :  { %v101_v33 = vsel %vm97_vm9, %v100_v31, %v91_v28 }
 0x2ef   :  { %v108_v34 = vmul.f32 %v104_v32, %v101_v33 }
 0x2f1   :  { %109 = vadd.xlane.f32.xlu1 %v108_v34 }
 0x37e   :  { %v110_v35 = vpop.xlane.xlu1 %109 }
 0x37f   :  { %v111_v36 = vsel %vm107_vm10, %v110_v35, %v101_v33 }
 0x380   :  { %v113_v37 = vmul.f32 %v159_v7, %v111_v36 }
 0x382   :  { %v115_v38 = vsel %vm114_vm11, %v111_v36, %v113_v37 }
 0x383   :  { %145 = vst [vmem:[%s178_s1] sm:$0xff] %v115_v38 }

// kernel: custom-call.24
= control target key start
LH: loop header
LB: loop body
LE: loop exit
PB: predicated region body
PF: predicated region fallthrough
CT: control target
= control target key end

     0   :  { %v264_v0 = vmov 0.0   ;;  %vm35_vm0 = vcmask 7168   ;;  %vm53_vm1 = vcmask 15368   ;;  %vm70_vm2 = vcmask 1047553   ;;  %s292_s0 = inlined_call_operand.vmem [shape: f32[8,8], index: 0, kind: input, shape index: {}]   ;;  %s293_s1 = inlined_call_operand.vmem [shape: f32[8,8], index: 1, kind: output, shape index: {}]  }
   0x1   :  { %34 = vst [vmem:[#allocation1] sm:$0xff] %v264_v0  ;;  %v278_v4 = vld [vmem:[%s292_s0] sm:$0xff]  ;;  %vm71_vm3 = vmand %vm53_vm1, %vm70_vm2  ;;  %vm75_vm4 = vcmask 23568   ;;  %vm92_vm5 = vcmask 1047554   ;;  %vm97_vm7 = vcmask 31768   ;;  %vm114_vm8 = vcmask 1047555  }
   0x2   :  { %30 = vst [vmem:[#allocation0] sm:$0xff] %v278_v4  ;;  %vm93_vm6 = vmand %vm75_vm4, %vm92_vm5  ;;  %vm119_vm10 = vcmask 39968   ;;  %vm136_vm11 = vcmask 1047556   ;;  %vm141_vm13 = vcmask 48168   ;;  %vm158_vm14 = vcmask 1047557  }
   0x3   :  { %vm115_vm9 = vmand %vm97_vm7, %vm114_vm8  ;;  %vm180_vm1 = vcmask 1047558   ;;  %vm202_vm4 = vcmask 1047559  }
   0x4   :  { %vm137_vm12 = vmand %vm119_vm10, %vm136_vm11 }
   0x5   :  { %vm159_vm15 = vmand %vm141_vm13, %vm158_vm14 }
   0x8   :  { %v36_v1 = vld [vmem:[#allocation1] ss:$0 sm:$0xff] }
   0x9   :  { %v38_v2 = vmul.f32 %v36_v1, %v36_v1  ;;  %v45_v3 = vmul.f32 0.0, %v36_v1  ;;  %v37_v5 = vld [vmem:[#allocation0] ss:$0 sm:$0xff]  ;;  %v57_v16 = vld [vmem:[#allocation0 + $0x1] ss:$0 sm:$0xff] }
   0xa   :  { %v79_v28 = vld [vmem:[#allocation0 + $0x2] ss:$0 sm:$0xff]  ;;  %v101_v40 = vld [vmem:[#allocation0 + $0x3] ss:$0 sm:$0xff]  ;;  %v123_v52 = vld [vmem:[#allocation0 + $0x4] ss:$0 sm:$0xff] }
   0xb   :  { %39 = vadd.xlane.f32.xlu0 %v38_v2  ;;  %v145_v0 = vld [vmem:[#allocation0 + $0x5] ss:$0 sm:$0xff] }
   0xf   :  { %46 = vadd.xlane.f32.xlu0 %v45_v3 }
  0x98   :  { %v40_v6 = vpop.xlane.xlu0 %39 }
  0x99   :  { %v41_v7 = vsub.f32 %v37_v5, %v40_v6 }
  0x9b   :  { %248 = vrsqrt.f32 %v41_v7 }
  0x9c   :  { %v47_v8 = vpop.xlane.xlu0 %46 }
  0x9d   :  { %v48_v9 = vsub.f32 %v278_v4, %v47_v8 }
  0xa5   :  { %v249_v10 = vpop.eup %248 }
  0xa6   :  { %v49_v11 = vmul.f32 %v249_v10, %v48_v9 }
  0xa8   :  { %v50_v12 = vsel %vm35_vm0, %v49_v11, 0.0  ;;  %vm163_vm0 = vcmask 56368  }
  0xa9   :  { %52 = vst [vmem:[#allocation1] sm:$0xff] %v50_v12  ;;  %vm181_vm2 = vmand %vm163_vm0, %vm180_vm1 }
  0xb0   :  { %v55_v13 = vld [vmem:[#allocation1 + $0x1] ss:$0 sm:$0xff] }
  0xb1   :  { %v58_v14 = vmul.f32 %v55_v13, %v55_v13  ;;  %v65_v15 = vmul.f32 %v55_v13, %v50_v12  ;;  %v167_v13 = vld [vmem:[#allocation0 + $0x6] ss:$0 sm:$0xff] }
  0xb3   :  { %59 = vadd.xlane.f32.xlu1 %v58_v14 }
  0xb7   :  { %66 = vadd.xlane.f32.xlu1 %v65_v15 }
 0x140   :  { %v60_v17 = vpop.xlane.xlu1 %59 }
 0x141   :  { %v61_v18 = vsub.f32 %v57_v16, %v60_v17 }
 0x143   :  { %250 = vrsqrt.f32 %v61_v18 }
 0x144   :  { %v67_v19 = vpop.xlane.xlu1 %66 }
 0x145   :  { %v68_v20 = vsub.f32 %v278_v4, %v67_v19 }
 0x14d   :  { %v251_v21 = vpop.eup %250 }
 0x14e   :  { %v69_v22 = vmul.f32 %v251_v21, %v68_v20 }
 0x150   :  { %v72_v23 = vsel %vm71_vm3, %v69_v22, 0.0  ;;  %vm185_vm3 = vcmask 64568  }
 0x151   :  { %v73_v24 = vadd.f32 %v72_v23, %v50_v12  ;;  %vm203_vm5 = vmand %vm185_vm3, %vm202_vm4 }
 0x153   :  { %74 = vst [vmem:[#allocation1] sm:$0xff] %v73_v24 }
 0x15a   :  { %v77_v25 = vld [vmem:[#allocation1 + $0x2] ss:$0 sm:$0xff] }
 0x15b   :  { %v87_v26 = vmul.f32 %v77_v25, %v73_v24  ;;  %v80_v27 = vmul.f32 %v77_v25, %v77_v25  ;;  %v189_v25 = vld [vmem:[#allocation0 + $0x7] ss:$0 sm:$0xff] }
 0x15d   :  { %88 = vadd.xlane.f32.xlu1 %v87_v26  ;;  %81 = vadd.xlane.f32.xlu0 %v80_v27 }
 0x1ea   :  { %v82_v29 = vpop.xlane.xlu0 %81  ;;  %v89_v31 = vpop.xlane.xlu1 %88 }
 0x1eb   :  { %v83_v30 = vsub.f32 %v79_v28, %v82_v29  ;;  %v90_v32 = vsub.f32 %v278_v4, %v89_v31 }
 0x1ed   :  { %252 = vrsqrt.f32 %v83_v30 }
 0x1f7   :  { %v253_v33 = vpop.eup %252 }
 0x1f8   :  { %v91_v34 = vmul.f32 %v253_v33, %v90_v32 }
 0x1fa   :  { %v94_v35 = vsel %vm93_vm6, %v91_v34, 0.0 }
 0x1fb   :  { %v95_v36 = vadd.f32 %v94_v35, %v73_v24 }
 0x1fd   :  { %96 = vst [vmem:[#allocation1] sm:$0xff] %v95_v36 }
 0x204   :  { %v99_v37 = vld [vmem:[#allocation1 + $0x3] ss:$0 sm:$0xff] }
 0x205   :  { %v109_v38 = vmul.f32 %v99_v37, %v95_v36  ;;  %v102_v39 = vmul.f32 %v99_v37, %v99_v37 }
 0x207   :  { %110 = vadd.xlane.f32.xlu1 %v109_v38  ;;  %103 = vadd.xlane.f32.xlu0 %v102_v39 }
 0x294   :  { %v104_v41 = vpop.xlane.xlu0 %103  ;;  %v111_v43 = vpop.xlane.xlu1 %110 }
 0x295   :  { %v105_v42 = vsub.f32 %v101_v40, %v104_v41  ;;  %v112_v44 = vsub.f32 %v278_v4, %v111_v43 }
 0x297   :  { %254 = vrsqrt.f32 %v105_v42 }
 0x2a1   :  { %v255_v45 = vpop.eup %254 }
 0x2a2   :  { %v113_v46 = vmul.f32 %v255_v45, %v112_v44 }
 0x2a4   :  { %v116_v47 = vsel %vm115_vm9, %v113_v46, 0.0 }
 0x2a5   :  { %v117_v48 = vadd.f32 %v116_v47, %v95_v36 }
 0x2a7   :  { %118 = vst [vmem:[#allocation1] sm:$0xff] %v117_v48 }
 0x2ae   :  { %v121_v49 = vld [vmem:[#allocation1 + $0x4] ss:$0 sm:$0xff] }
 0x2af   :  { %v131_v50 = vmul.f32 %v121_v49, %v117_v48  ;;  %v124_v51 = vmul.f32 %v121_v49, %v121_v49 }
 0x2b1   :  { %132 = vadd.xlane.f32.xlu1 %v131_v50  ;;  %125 = vadd.xlane.f32.xlu0 %v124_v51 }
 0x33e   :  { %v126_v53 = vpop.xlane.xlu0 %125  ;;  %v133_v55 = vpop.xlane.xlu1 %132 }
 0x33f   :  { %v127_v54 = vsub.f32 %v123_v52, %v126_v53  ;;  %v134_v56 = vsub.f32 %v278_v4, %v133_v55 }
 0x341   :  { %256 = vrsqrt.f32 %v127_v54 }
 0x34b   :  { %v257_v57 = vpop.eup %256 }
 0x34c   :  { %v135_v58 = vmul.f32 %v257_v57, %v134_v56 }
 0x34e   :  { %v138_v59 = vsel %vm137_vm12, %v135_v58, 0.0 }
 0x34f   :  { %v139_v60 = vadd.f32 %v138_v59, %v117_v48 }
 0x351   :  { %140 = vst [vmem:[#allocation1] sm:$0xff] %v139_v60 }
 0x358   :  { %v143_v61 = vld [vmem:[#allocation1 + $0x5] ss:$0 sm:$0xff] }
 0x359   :  { %v153_v62 = vmul.f32 %v143_v61, %v139_v60  ;;  %v146_v63 = vmul.f32 %v143_v61, %v143_v61 }
 0x35b   :  { %154 = vadd.xlane.f32.xlu1 %v153_v62  ;;  %147 = vadd.xlane.f32.xlu0 %v146_v63 }
 0x3e8   :  { %v148_v1 = vpop.xlane.xlu0 %147  ;;  %v155_v3 = vpop.xlane.xlu1 %154 }
 0x3e9   :  { %v149_v2 = vsub.f32 %v145_v0, %v148_v1  ;;  %v156_v5 = vsub.f32 %v278_v4, %v155_v3 }
 0x3eb   :  { %258 = vrsqrt.f32 %v149_v2 }
 0x3f5   :  { %v259_v6 = vpop.eup %258 }
 0x3f6   :  { %v157_v7 = vmul.f32 %v259_v6, %v156_v5 }
 0x3f8   :  { %v160_v8 = vsel %vm159_vm15, %v157_v7, 0.0 }
 0x3f9   :  { %v161_v9 = vadd.f32 %v160_v8, %v139_v60 }
 0x3fb   :  { %162 = vst [vmem:[#allocation1] sm:$0xff] %v161_v9 }
 0x402   :  { %v165_v10 = vld [vmem:[#allocation1 + $0x6] ss:$0 sm:$0xff] }
 0x403   :  { %v175_v11 = vmul.f32 %v165_v10, %v161_v9  ;;  %v168_v12 = vmul.f32 %v165_v10, %v165_v10 }
 0x405   :  { %176 = vadd.xlane.f32.xlu1 %v175_v11  ;;  %169 = vadd.xlane.f32.xlu0 %v168_v12 }
 0x492   :  { %v170_v14 = vpop.xlane.xlu0 %169  ;;  %v177_v16 = vpop.xlane.xlu1 %176 }
 0x493   :  { %v171_v15 = vsub.f32 %v167_v13, %v170_v14  ;;  %v178_v17 = vsub.f32 %v278_v4, %v177_v16 }
 0x495   :  { %260 = vrsqrt.f32 %v171_v15 }
 0x49f   :  { %v261_v18 = vpop.eup %260 }
 0x4a0   :  { %v179_v19 = vmul.f32 %v261_v18, %v178_v17 }
 0x4a2   :  { %v182_v20 = vsel %vm181_vm2, %v179_v19, 0.0 }
 0x4a3   :  { %v183_v21 = vadd.f32 %v182_v20, %v161_v9 }
 0x4a5   :  { %184 = vst [vmem:[#allocation1] sm:$0xff] %v183_v21 }
 0x4ac   :  { %v187_v22 = vld [vmem:[#allocation1 + $0x7] ss:$0 sm:$0xff] }
 0x4ad   :  { %v197_v23 = vmul.f32 %v187_v22, %v183_v21  ;;  %v190_v24 = vmul.f32 %v187_v22, %v187_v22 }
 0x4af   :  { %198 = vadd.xlane.f32.xlu1 %v197_v23  ;;  %191 = vadd.xlane.f32.xlu0 %v190_v24 }
 0x53c   :  { %v192_v26 = vpop.xlane.xlu0 %191  ;;  %v199_v28 = vpop.xlane.xlu1 %198 }
 0x53d   :  { %v193_v27 = vsub.f32 %v189_v25, %v192_v26  ;;  %v200_v29 = vsub.f32 %v278_v4, %v199_v28 }
 0x53f   :  { %262 = vrsqrt.f32 %v193_v27 }
 0x549   :  { %v263_v30 = vpop.eup %262 }
 0x54a   :  { %v201_v31 = vmul.f32 %v263_v30, %v200_v29 }
 0x54c   :  { %v204_v32 = vsel %vm203_vm5, %v201_v31, 0.0 }
 0x54d   :  { %v205_v33 = vadd.f32 %v204_v32, %v183_v21 }
 0x54f   :  { %206 = vst [vmem:[#allocation1] sm:$0xff] %v205_v33  ;;  %235 = vst [vmem:[%s293_s1] sm:$0xff] %v205_v33 }

// kernel: custom-call.25
= control target key start
LH: loop header
LB: loop body
LE: loop exit
PB: predicated region body
PF: predicated region fallthrough
CT: control target
= control target key end

     0   :  { %v34_v0 = vlaneseq  ;;  %v180_v9 = vmov -1.0   ;;  %s215_s0 = inlined_call_operand.vmem [shape: f32[1,8,8], index: 0, kind: input, shape index: {}]   ;;  %s216_s1 = inlined_call_operand.vmem [shape: f32[1,8,8], index: 1, kind: output, shape index: {}]  }
   0x1   :  { %v29_v1 = vld [vmem:[%s215_s0] sm:$0xff] }
   0x2   :  { %v194_v2 = vand.u32 127, %v34_v0  ;;  %v38_v3 = vshrl.u32 %v34_v0, 7 }
   0x4   :  { %vm36_vm0 = vcmp.lt.s32.totalorder %v194_v2, 8  ;;  %vm40_vm1 = vcmp.eq.s32.totalorder %v38_v3, %v194_v2  ;;  %vm45_vm2 = vcmp.ge.s32.totalorder %v38_v3, %v194_v2  ;;  %vm59_vm4 = vcmp.eq.s32.totalorder %v194_v2, 0 }
   0x5   :  { %v42_v4 = vsel %vm40_vm1, %v29_v1, 0.0  ;;  %vm46_vm3 = vmand %vm45_vm2, %vm36_vm0  ;;  %vm56_vm5 = vcmp.eq.s32.totalorder %v194_v2, %v38_v3  ;;  %v60_v10 = vsel %vm59_vm4, 1.0, %v180_v9  ;;  %vm67_vm6 = vcmp.eq.s32.totalorder %v194_v2, 1 }
   0x6   :  { %v47_v5 = vsel %vm46_vm3, %v29_v1, 0.0  ;;  %43 = vadd.xlane.f32.xlu0 %v42_v4  ;;  %v61_v11 = vsel %vm56_vm5, %v60_v10, 0.0  ;;  %vm77_vm7 = vcmp.eq.s32.totalorder %v194_v2, 2  ;;  %vm87_vm8 = vcmp.eq.s32.totalorder %v194_v2, 3 }
   0x7   :  { %vm97_vm9 = vcmp.eq.s32.totalorder %v194_v2, 4  ;;  %vm107_vm10 = vcmp.eq.s32.totalorder %v194_v2, 5  ;;  %vm117_vm11 = vcmp.eq.s32.totalorder %v194_v2, 6  ;;  %vm127_vm12 = vcmp.eq.s32.totalorder %v194_v2, 7 }
  0x93   :  { %v199_v6 = vpop.xlane.xlu0 %43 }
  0x94   :  { %178 = vrcp.f32 %v199_v6  ;;  %vm134_vm13 = vweird.f32 %v199_v6 }
  0x9e   :  { %v179_v7 = vpop.eup %178 }
  0x9f   :  { %v49_v8 = vmul.f32 %v179_v7, %v47_v5 }
  0xa1   :  { %50 = vst [vmem:[#allocation2] sm:$0xff] %v49_v8 }
  0xa8   :  { %v63_v12 = vld [vmem:[#allocation2 + $0x1] ss:$0 sm:$0xff]  ;;  %v73_v15 = vld [vmem:[#allocation2 + $0x2] ss:$0 sm:$0xff]  ;;  %v83_v20 = vld [vmem:[#allocation2 + $0x3] ss:$0 sm:$0xff] }
  0xa9   :  { %v64_v13 = vxor.u32 2147483648, %v63_v12  ;;  %v74_v17 = vxor.u32 2147483648, %v73_v15  ;;  %v84_v22 = vxor.u32 2147483648, %v83_v20  ;;  %v93_v25 = vld [vmem:[#allocation2 + $0x4] ss:$0 sm:$0xff] }
  0xaa   :  { %v94_v27 = vxor.u32 2147483648, %v93_v25  ;;  %v103_v30 = vld [vmem:[#allocation2 + $0x5] ss:$0 sm:$0xff]  ;;  %v113_v35 = vld [vmem:[#allocation2 + $0x6] ss:$0 sm:$0xff] }
  0xab   :  { %v68_v14 = vmul.f32 %v64_v13, %v61_v11  ;;  %v104_v32 = vxor.u32 2147483648, %v103_v30  ;;  %v114_v37 = vxor.u32 2147483648, %v113_v35  ;;  %v123_v40 = vld [vmem:[#allocation2 + $0x7] ss:$0 sm:$0xff] }
  0xac   :  { %v124_v42 = vxor.u32 2147483648, %v123_v40 }
  0xad   :  { %69 = vadd.xlane.f32.xlu0 %v68_v14 }
 0x13a   :  { %v70_v16 = vpop.xlane.xlu0 %69 }
 0x13b   :  { %v71_v18 = vsel %vm67_vm6, %v70_v16, %v61_v11 }
 0x13c   :  { %v78_v19 = vmul.f32 %v74_v17, %v71_v18 }
 0x13e   :  { %79 = vadd.xlane.f32.xlu1 %v78_v19 }
 0x1cb   :  { %v80_v21 = vpop.xlane.xlu1 %79 }
 0x1cc   :  { %v81_v23 = vsel %vm77_vm7, %v80_v21, %v71_v18 }
 0x1cd   :  { %v88_v24 = vmul.f32 %v84_v22, %v81_v23 }
 0x1cf   :  { %89 = vadd.xlane.f32.xlu1 %v88_v24 }
 0x25c   :  { %v90_v26 = vpop.xlane.xlu1 %89 }
 0x25d   :  { %v91_v28 = vsel %vm87_vm8, %v90_v26, %v81_v23 }
 0x25e   :  { %v98_v29 = vmul.f32 %v94_v27, %v91_v28 }
 0x260   :  { %99 = vadd.xlane.f32.xlu0 %v98_v29 }
 0x2ed   :  { %v100_v31 = vpop.xlane.xlu0 %99 }
 0x2ee   :  { %v101_v33 = vsel %vm97_vm9, %v100_v31, %v91_v28 }
 0x2ef   :  { %v108_v34 = vmul.f32 %v104_v32, %v101_v33 }
 0x2f1   :  { %109 = vadd.xlane.f32.xlu1 %v108_v34 }
 0x37e   :  { %v110_v36 = vpop.xlane.xlu1 %109 }
 0x37f   :  { %v111_v38 = vsel %vm107_vm10, %v110_v36, %v101_v33 }
 0x380   :  { %v118_v39 = vmul.f32 %v114_v37, %v111_v38 }
 0x382   :  { %119 = vadd.xlane.f32.xlu0 %v118_v39 }
 0x40f   :  { %v120_v41 = vpop.xlane.xlu0 %119 }
 0x410   :  { %v121_v43 = vsel %vm117_vm11, %v120_v41, %v111_v38 }
 0x411   :  { %v128_v44 = vmul.f32 %v124_v42, %v121_v43 }
 0x413   :  { %129 = vadd.xlane.f32.xlu1 %v128_v44 }
 0x4a0   :  { %v130_v45 = vpop.xlane.xlu1 %129 }
 0x4a1   :  { %v131_v46 = vsel %vm127_vm12, %v130_v45, %v121_v43 }
 0x4a2   :  { %v133_v47 = vmul.f32 %v179_v7, %v131_v46 }
 0x4a4   :  { %v135_v48 = vsel %vm134_vm13, %v131_v46, %v133_v47 }
 0x4a5   :  { %165 = vst [vmem:[%s216_s1] sm:$0xff] %v135_v48 }

// kernel: custom-call.20
= control target key start
LH: loop header
LB: loop body
LE: loop exit
PB: predicated region body
PF: predicated region fallthrough
CT: control target
= control target key end

     0   :  { %v484_v0 = vmov 0.0   ;;  %vm41_vm0 = vcmask 7168   ;;  %vm72_vm1 = vcmask 15368   ;;  %vm89_vm2 = vcmask 1047553   ;;  %s546_s0 = inlined_call_operand.vmem [shape: f32[12,12], index: 0, kind: input, shape index: {}]   ;;  %s547_s1 = inlined_call_operand.vmem [shape: f32[12,12], index: 1, kind: output, shape index: {}]  }
   0x1   :  { %38 = vst [vmem:[#allocation1] sm:$0xff] %v484_v0  ;;  %v498_v4 = vld [vmem:[%s546_s0] sm:$0xff]  ;;  %v504_v5 = vld [vmem:[%s546_s0 + $0x8] sm:$0xff]  ;;  %vm90_vm3 = vmand %vm72_vm1, %vm89_vm2  ;;  %vm107_vm4 = vcmask 23568   ;;  %vm124_vm5 = vcmask 1047554   ;;  %vm142_vm7 = vcmask 31768  }
   0x2   :  { %32 = vst [vmem:[#allocation0] sm:$0xff] %v498_v4  ;;  %34 = vst [vmem:[#allocation0 + $0x8] sm:$0xff] %v504_v5  ;;  %vm159_vm8 = vcmask 1047555   ;;  %vm177_vm10 = vcmask 39968   ;;  %vm194_vm11 = vcmask 1047556   ;;  %vm212_vm13 = vcmask 48168  }
   0x3   :  { %vm125_vm6 = vmand %vm107_vm4, %vm124_vm5  ;;  %vm229_vm14 = vcmask 1047557  }
   0x4   :  { %vm160_vm9 = vmand %vm142_vm7, %vm159_vm8 }
   0x5   :  { %vm195_vm12 = vmand %vm177_vm10, %vm194_vm11  ;;  %vm365_vm11 = vcmask 89168  }
   0x6   :  { %vm230_vm15 = vmand %vm212_vm13, %vm229_vm14 }
   0x8   :  { %v42_v1 = vld [vmem:[#allocation1] ss:$0 sm:$0xff] }
   0x9   :  { %v44_v2 = vmul.f32 %v42_v1, %v42_v1  ;;  %v63_v3 = vmul.f32 0.0, %v42_v1  ;;  %v43_v6 = vld [vmem:[#allocation0] ss:$0 sm:$0xff]  ;;  %v76_v22 = vld [vmem:[#allocation0 + $0x1] ss:$0 sm:$0xff] }
   0xa   :  { %v111_v40 = vld [vmem:[#allocation0 + $0x2] ss:$0 sm:$0xff]  ;;  %v146_v58 = vld [vmem:[#allocation0 + $0x3] ss:$0 sm:$0xff] }
   0xb   :  { %45 = vadd.xlane.f32.xlu0 %v44_v2  ;;  %64 = vadd.xlane.f32.xlu1 %v63_v3 }
   0xf   :  { %52 = vadd.xlane.f32.xlu0 %v63_v3 }
  0x98   :  { %v46_v7 = vpop.xlane.xlu0 %45  ;;  %v65_v13 = vpop.xlane.xlu1 %64 }
  0x99   :  { %v47_v8 = vsub.f32 %v43_v6, %v46_v7  ;;  %v66_v15 = vsub.f32 %v504_v5, %v65_v13 }
  0x9b   :  { %460 = vrsqrt.f32 %v47_v8 }
  0x9c   :  { %v53_v9 = vpop.xlane.xlu0 %52 }
  0x9d   :  { %v54_v10 = vsub.f32 %v498_v4, %v53_v9 }
  0xa5   :  { %v461_v11 = vpop.eup %460 }
  0xa6   :  { %v55_v12 = vmul.f32 %v461_v11, %v54_v10  ;;  %v67_v16 = vmul.f32 %v461_v11, %v66_v15 }
  0xa8   :  { %v56_v14 = vsel %vm41_vm0, %v55_v12, 0.0  ;;  %v68_v17 = vsel %vm41_vm0, %v67_v16, 0.0  ;;  %vm247_vm0 = vcmask 56368  }
  0xa9   :  { %58 = vst [vmem:[#allocation1] sm:$0xff] %v56_v14 }
  0xb0   :  { %v74_v18 = vld [vmem:[#allocation1 + $0x1] ss:$0 sm:$0xff] }
  0xb1   :  { %v84_v19 = vmul.f32 %v74_v18, %v56_v14  ;;  %v77_v20 = vmul.f32 %v74_v18, %v74_v18  ;;  %v98_v21 = vmul.f32 %v74_v18, %v68_v17 }
  0xb3   :  { %85 = vadd.xlane.f32.xlu0 %v84_v19  ;;  %78 = vadd.xlane.f32.xlu1 %v77_v20 }
  0xb7   :  { %99 = vadd.xlane.f32.xlu1 %v98_v21 }
 0x140   :  { %v79_v23 = vpop.xlane.xlu1 %78  ;;  %v86_v25 = vpop.xlane.xlu0 %85 }
 0x141   :  { %v80_v24 = vsub.f32 %v76_v22, %v79_v23  ;;  %v87_v26 = vsub.f32 %v498_v4, %v86_v25 }
 0x143   :  { %462 = vrsqrt.f32 %v80_v24 }
 0x144   :  { %v100_v31 = vpop.xlane.xlu1 %99 }
 0x145   :  { %v101_v32 = vsub.f32 %v504_v5, %v100_v31 }
 0x14d   :  { %v463_v27 = vpop.eup %462 }
 0x14e   :  { %v88_v28 = vmul.f32 %v463_v27, %v87_v26  ;;  %v102_v33 = vmul.f32 %v463_v27, %v101_v32  ;;  %v216_v32 = vld [vmem:[#allocation0 + $0x5] ss:$0 sm:$0xff] }
 0x150   :  { %v91_v29 = vsel %vm90_vm3, %v88_v28, 0.0  ;;  %v103_v34 = vsel %vm72_vm1, %v102_v33, 0.0  ;;  %vm264_vm1 = vcmask 1047558  }
 0x151   :  { %v92_v30 = vadd.f32 %v91_v29, %v56_v14  ;;  %v104_v38 = vadd.f32 %v103_v34, %v68_v17  ;;  %v181_v14 = vld [vmem:[#allocation0 + $0x4] ss:$0 sm:$0xff]  ;;  %vm265_vm3 = vmand %vm247_vm0, %vm264_vm1 }
 0x153   :  { %93 = vst [vmem:[#allocation1] sm:$0xff] %v92_v30 }
 0x15a   :  { %v109_v35 = vld [vmem:[#allocation1 + $0x2] ss:$0 sm:$0xff] }
 0x15b   :  { %v119_v36 = vmul.f32 %v109_v35, %v92_v30  ;;  %v112_v37 = vmul.f32 %v109_v35, %v109_v35  ;;  %v133_v39 = vmul.f32 %v109_v35, %v104_v38 }
 0x15d   :  { %120 = vadd.xlane.f32.xlu1 %v119_v36  ;;  %113 = vadd.xlane.f32.xlu0 %v112_v37 }
 0x161   :  { %134 = vadd.xlane.f32.xlu0 %v133_v39 }
 0x1ea   :  { %v114_v41 = vpop.xlane.xlu0 %113  ;;  %v121_v43 = vpop.xlane.xlu1 %120 }
 0x1eb   :  { %v115_v42 = vsub.f32 %v111_v40, %v114_v41  ;;  %v122_v44 = vsub.f32 %v498_v4, %v121_v43 }
 0x1ed   :  { %464 = vrsqrt.f32 %v115_v42 }
 0x1ee   :  { %v135_v49 = vpop.xlane.xlu0 %134 }
 0x1ef   :  { %v136_v50 = vsub.f32 %v504_v5, %v135_v49 }
 0x1f7   :  { %v465_v45 = vpop.eup %464 }
 0x1f8   :  { %v123_v46 = vmul.f32 %v465_v45, %v122_v44  ;;  %v137_v51 = vmul.f32 %v465_v45, %v136_v50  ;;  %v251_v50 = vld [vmem:[#allocation0 + $0x6] ss:$0 sm:$0xff] }
 0x1fa   :  { %v126_v47 = vsel %vm125_vm6, %v123_v46, 0.0  ;;  %v138_v52 = vsel %vm107_vm4, %v137_v51, 0.0  ;;  %vm282_vm4 = vcmask 64568   ;;  %vm317_vm6 = vcmask 72768  }
 0x1fb   :  { %v127_v48 = vadd.f32 %v126_v47, %v92_v30  ;;  %v139_v56 = vadd.f32 %v138_v52, %v104_v38 }
 0x1fd   :  { %128 = vst [vmem:[#allocation1] sm:$0xff] %v127_v48 }
 0x204   :  { %v144_v53 = vld [vmem:[#allocation1 + $0x3] ss:$0 sm:$0xff] }
 0x205   :  { %v154_v54 = vmul.f32 %v144_v53, %v127_v48  ;;  %v147_v55 = vmul.f32 %v144_v53, %v144_v53  ;;  %v168_v57 = vmul.f32 %v144_v53, %v139_v56 }
 0x207   :  { %155 = vadd.xlane.f32.xlu0 %v154_v54  ;;  %148 = vadd.xlane.f32.xlu1 %v147_v55 }
 0x20b   :  { %169 = vadd.xlane.f32.xlu1 %v168_v57 }
 0x294   :  { %v149_v59 = vpop.xlane.xlu1 %148  ;;  %v156_v61 = vpop.xlane.xlu0 %155 }
 0x295   :  { %v150_v60 = vsub.f32 %v146_v58, %v149_v59  ;;  %v157_v62 = vsub.f32 %v498_v4, %v156_v61 }
 0x297   :  { %466 = vrsqrt.f32 %v150_v60 }
 0x298   :  { %v170_v3 = vpop.xlane.xlu1 %169 }
 0x299   :  { %v171_v6 = vsub.f32 %v504_v5, %v170_v3  ;;  %v286_v3 = vld [vmem:[#allocation0 + $0x7] ss:$0 sm:$0xff] }
 0x2a1   :  { %v467_v63 = vpop.eup %466 }
 0x2a2   :  { %v158_v0 = vmul.f32 %v467_v63, %v157_v62  ;;  %v172_v7 = vmul.f32 %v467_v63, %v171_v6 }
 0x2a4   :  { %v161_v1 = vsel %vm160_vm9, %v158_v0, 0.0  ;;  %v173_v8 = vsel %vm142_vm7, %v172_v7, 0.0  ;;  %vm340_vm7 = vcmask 80968  }
 0x2a5   :  { %v162_v2 = vadd.f32 %v161_v1, %v127_v48  ;;  %v174_v12 = vadd.f32 %v173_v8, %v139_v56  ;;  %vm360_vm9 = vmand %vm340_vm7, %vm89_vm2 }
 0x2a7   :  { %163 = vst [vmem:[#allocation1] sm:$0xff] %v162_v2 }
 0x2ae   :  { %v179_v9 = vld [vmem:[#allocation1 + $0x4] ss:$0 sm:$0xff] }
 0x2af   :  { %v189_v10 = vmul.f32 %v179_v9, %v162_v2  ;;  %v182_v11 = vmul.f32 %v179_v9, %v179_v9  ;;  %v203_v13 = vmul.f32 %v179_v9, %v174_v12 }
 0x2b1   :  { %190 = vadd.xlane.f32.xlu1 %v189_v10  ;;  %183 = vadd.xlane.f32.xlu0 %v182_v11 }
 0x2b5   :  { %204 = vadd.xlane.f32.xlu0 %v203_v13 }
 0x33e   :  { %v184_v15 = vpop.xlane.xlu0 %183  ;;  %v191_v17 = vpop.xlane.xlu1 %190 }
 0x33f   :  { %v185_v16 = vsub.f32 %v181_v14, %v184_v15  ;;  %v192_v18 = vsub.f32 %v498_v4, %v191_v17  ;;  %v321_v17 = vld [vmem:[#allocation0 + $0x8] ss:$0 sm:$0xff] }
 0x341   :  { %468 = vrsqrt.f32 %v185_v16 }
 0x342   :  { %v205_v23 = vpop.xlane.xlu0 %204 }
 0x343   :  { %v206_v24 = vsub.f32 %v504_v5, %v205_v23 }
 0x34b   :  { %v469_v19 = vpop.eup %468 }
 0x34c   :  { %v193_v20 = vmul.f32 %v469_v19, %v192_v18  ;;  %v207_v25 = vmul.f32 %v469_v19, %v206_v24 }
 0x34e   :  { %v196_v21 = vsel %vm195_vm12, %v193_v20, 0.0  ;;  %v208_v26 = vsel %vm177_vm10, %v207_v25, 0.0  ;;  %vm299_vm10 = vcmask 1047559   ;;  %vm385_vm12 = vmand %vm365_vm11, %vm124_vm5 }
 0x34f   :  { %v197_v22 = vadd.f32 %v196_v21, %v162_v2  ;;  %v209_v30 = vadd.f32 %v208_v26, %v174_v12  ;;  %vm300_vm2 = vmand %vm282_vm4, %vm299_vm10 }
 0x351   :  { %198 = vst [vmem:[#allocation1] sm:$0xff] %v197_v22 }
 0x358   :  { %v214_v27 = vld [vmem:[#allocation1 + $0x5] ss:$0 sm:$0xff] }
 0x359   :  { %v224_v28 = vmul.f32 %v214_v27, %v197_v22  ;;  %v217_v29 = vmul.f32 %v214_v27, %v214_v27  ;;  %v238_v31 = vmul.f32 %v214_v27, %v209_v30 }
 0x35b   :  { %225 = vadd.xlane.f32.xlu0 %v224_v28  ;;  %218 = vadd.xlane.f32.xlu1 %v217_v29  ;;  %v344_v29 = vld [vmem:[#allocation0 + $0x9] ss:$0 sm:$0xff] }
 0x35f   :  { %239 = vadd.xlane.f32.xlu1 %v238_v31 }
 0x3e8   :  { %v219_v33 = vpop.xlane.xlu1 %218  ;;  %v226_v35 = vpop.xlane.xlu0 %225 }
 0x3e9   :  { %v220_v34 = vsub.f32 %v216_v32, %v219_v33  ;;  %v227_v36 = vsub.f32 %v498_v4, %v226_v35 }
 0x3eb   :  { %470 = vrsqrt.f32 %v220_v34 }
 0x3ec   :  { %v240_v41 = vpop.xlane.xlu1 %239 }
 0x3ed   :  { %v241_v42 = vsub.f32 %v504_v5, %v240_v41 }
 0x3f5   :  { %v471_v37 = vpop.eup %470 }
 0x3f6   :  { %v228_v38 = vmul.f32 %v471_v37, %v227_v36  ;;  %v242_v43 = vmul.f32 %v471_v37, %v241_v42  ;;  %v369_v42 = vld [vmem:[#allocation0 + $0xa] ss:$0 sm:$0xff] }
 0x3f8   :  { %v231_v39 = vsel %vm230_vm15, %v228_v38, 0.0  ;;  %v243_v44 = vsel %vm212_vm13, %v242_v43, 0.0  ;;  %vm390_vm13 = vcmask 97368  }
 0x3f9   :  { %v232_v40 = vadd.f32 %v231_v39, %v197_v22  ;;  %v244_v48 = vadd.f32 %v243_v44, %v209_v30  ;;  %vm410_vm5 = vmand %vm390_vm13, %vm159_vm8 }
 0x3fb   :  { %233 = vst [vmem:[#allocation1] sm:$0xff] %v232_v40 }
 0x402   :  { %v249_v45 = vld [vmem:[#allocation1 + $0x6] ss:$0 sm:$0xff] }
 0x403   :  { %v259_v46 = vmul.f32 %v249_v45, %v232_v40  ;;  %v252_v47 = vmul.f32 %v249_v45, %v249_v45  ;;  %v273_v49 = vmul.f32 %v249_v45, %v244_v48 }
 0x405   :  { %260 = vadd.xlane.f32.xlu1 %v259_v46  ;;  %253 = vadd.xlane.f32.xlu0 %v252_v47 }
 0x409   :  { %274 = vadd.xlane.f32.xlu0 %v273_v49 }
 0x492   :  { %v254_v51 = vpop.xlane.xlu0 %253  ;;  %v261_v53 = vpop.xlane.xlu1 %260 }
 0x493   :  { %v255_v52 = vsub.f32 %v251_v50, %v254_v51  ;;  %v262_v54 = vsub.f32 %v498_v4, %v261_v53 }
 0x495   :  { %472 = vrsqrt.f32 %v255_v52 }
 0x496   :  { %v275_v56 = vpop.xlane.xlu0 %274 }
 0x497   :  { %v276_v59 = vsub.f32 %v504_v5, %v275_v56 }
 0x49f   :  { %v473_v55 = vpop.eup %472 }
 0x4a0   :  { %v263_v57 = vmul.f32 %v473_v55, %v262_v54  ;;  %v277_v61 = vmul.f32 %v473_v55, %v276_v59 }
 0x4a2   :  { %v266_v58 = vsel %vm265_vm3, %v263_v57, 0.0  ;;  %v278_v62 = vsel %vm247_vm0, %v277_v61, 0.0 }
 0x4a3   :  { %v524_v60 = vadd.f32 %v266_v58, %v232_v40  ;;  %v279_v63 = vadd.f32 %v278_v62, %v244_v48  ;;  %v394_v58 = vld [vmem:[#allocation0 + $0xb] ss:$0 sm:$0xff] }
 0x4a5   :  { %268 = vst [vmem:[#allocation1] sm:$0xff] %v524_v60 }
 0x4ac   :  { %v284_v0 = vld [vmem:[#allocation1 + $0x7] ss:$0 sm:$0xff] }
 0x4ad   :  { %v308_v1 = vmul.f32 %v284_v0, %v279_v63  ;;  %v287_v2 = vmul.f32 %v284_v0, %v284_v0  ;;  %v294_v41 = vmul.f32 %v284_v0, %v524_v60 }
 0x4af   :  { %309 = vadd.xlane.f32.xlu0 %v308_v1  ;;  %288 = vadd.xlane.f32.xlu1 %v287_v2 }
 0x53c   :  { %v289_v6 = vpop.xlane.xlu1 %288  ;;  %v310_v8 = vpop.xlane.xlu0 %309 }
 0x53d   :  { %v290_v7 = vsub.f32 %v286_v3, %v289_v6  ;;  %v311_v9 = vsub.f32 %v504_v5, %v310_v8 }
 0x53f   :  { %474 = vrsqrt.f32 %v290_v7 }
 0x549   :  { %v475_v10 = vpop.eup %474 }
 0x54a   :  { %v312_v11 = vmul.f32 %v475_v10, %v311_v9 }
 0x54c   :  { %v313_v12 = vsel %vm282_vm4, %v312_v11, 0.0 }
 0x54d   :  { %v314_v13 = vadd.f32 %v313_v12, %v279_v63 }
 0x54f   :  { %316 = vst [vmem:[#allocation1 + $0x8] sm:$0xff] %v314_v13 }
 0x556   :  { %v319_v14 = vld [vmem:[#allocation1 + $0x8] ss:$0 sm:$0xff] }
 0x557   :  { %v331_v15 = vmul.f32 %v319_v14, %v314_v13  ;;  %v322_v16 = vmul.f32 %v319_v14, %v319_v14 }
 0x559   :  { %332 = vadd.xlane.f32.xlu0 %v331_v15  ;;  %323 = vadd.xlane.f32.xlu1 %v322_v16 }
 0x5e6   :  { %v324_v18 = vpop.xlane.xlu1 %323  ;;  %v333_v20 = vpop.xlane.xlu0 %332 }
 0x5e7   :  { %v325_v19 = vsub.f32 %v321_v17, %v324_v18  ;;  %v334_v21 = vsub.f32 %v504_v5, %v333_v20 }
 0x5e9   :  { %476 = vrsqrt.f32 %v325_v19 }
 0x5f3   :  { %v477_v22 = vpop.eup %476 }
 0x5f4   :  { %v335_v23 = vmul.f32 %v477_v22, %v334_v21 }
 0x5f6   :  { %v336_v24 = vsel %vm317_vm6, %v335_v23, 0.0 }
 0x5f7   :  { %v337_v25 = vadd.f32 %v336_v24, %v314_v13 }
 0x5f9   :  { %339 = vst [vmem:[#allocation1 + $0x8] sm:$0xff] %v337_v25 }
 0x600   :  { %v342_v26 = vld [vmem:[#allocation1 + $0x9] ss:$0 sm:$0xff] }
 0x601   :  { %v354_v27 = vmul.f32 %v342_v26, %v337_v25  ;;  %v345_v28 = vmul.f32 %v342_v26, %v342_v26 }
 0x603   :  { %355 = vadd.xlane.f32.xlu0 %v354_v27  ;;  %346 = vadd.xlane.f32.xlu1 %v345_v28 }
 0x690   :  { %v347_v30 = vpop.xlane.xlu1 %346  ;;  %v356_v32 = vpop.xlane.xlu0 %355 }
 0x691   :  { %v348_v31 = vsub.f32 %v344_v29, %v347_v30  ;;  %v357_v33 = vsub.f32 %v504_v5, %v356_v32 }
 0x693   :  { %478 = vrsqrt.f32 %v348_v31 }
 0x69d   :  { %v479_v34 = vpop.eup %478 }
 0x69e   :  { %v358_v35 = vmul.f32 %v479_v34, %v357_v33 }
 0x6a0   :  { %v361_v36 = vsel %vm360_vm9, %v358_v35, 0.0 }
 0x6a1   :  { %v362_v37 = vadd.f32 %v361_v36, %v337_v25 }
 0x6a3   :  { %364 = vst [vmem:[#allocation1 + $0x8] sm:$0xff] %v362_v37 }
 0x6aa   :  { %v367_v38 = vld [vmem:[#allocation1 + $0xa] ss:$0 sm:$0xff] }
 0x6ab   :  { %v379_v39 = vmul.f32 %v367_v38, %v362_v37  ;;  %v370_v40 = vmul.f32 %v367_v38, %v367_v38 }
 0x6ad   :  { %380 = vadd.xlane.f32.xlu0 %v379_v39  ;;  %371 = vadd.xlane.f32.xlu1 %v370_v40 }
 0x6b1   :  { %295 = vadd.xlane.f32.xlu0 %v294_v41 }
 0x73a   :  { %v381_v43 = vpop.xlane.xlu0 %380  ;;  %v372_v44 = vpop.xlane.xlu1 %371 }
 0x73b   :  { %v373_v45 = vsub.f32 %v369_v42, %v372_v44  ;;  %v382_v51 = vsub.f32 %v504_v5, %v381_v43 }
 0x73d   :  { %480 = vrsqrt.f32 %v373_v45 }
 0x73e   :  { %v296_v46 = vpop.xlane.xlu0 %295 }
 0x73f   :  { %v297_v47 = vsub.f32 %v498_v4, %v296_v46 }
 0x741   :  { %v298_v48 = vmul.f32 %v475_v10, %v297_v47 }
 0x743   :  { %v301_v49 = vsel %vm300_vm2, %v298_v48, 0.0 }
 0x744   :  { %v302_v50 = vadd.f32 %v301_v49, %v524_v60 }
 0x746   :  { %303 = vst [vmem:[#allocation1] sm:$0xff] %v302_v50  ;;  %445 = vst [vmem:[%s547_s1] sm:$0xff] %v302_v50 }
 0x747   :  { %v481_v52 = vpop.eup %480 }
 0x748   :  { %v383_v53 = vmul.f32 %v481_v52, %v382_v51 }
 0x74a   :  { %v386_v54 = vsel %vm385_vm12, %v383_v53, 0.0 }
 0x74b   :  { %v387_v4 = vadd.f32 %v386_v54, %v362_v37 }
 0x74d   :  { %389 = vst [vmem:[#allocation1 + $0x8] sm:$0xff] %v387_v4 }
 0x754   :  { %v392_v55 = vld [vmem:[#allocation1 + $0xb] ss:$0 sm:$0xff] }
 0x755   :  { %v395_v56 = vmul.f32 %v392_v55, %v392_v55  ;;  %v404_v57 = vmul.f32 %v392_v55, %v387_v4 }
 0x757   :  { %396 = vadd.xlane.f32.xlu1 %v395_v56 }
 0x75b   :  { %405 = vadd.xlane.f32.xlu1 %v404_v57 }
 0x7e4   :  { %v397_v59 = vpop.xlane.xlu1 %396 }
 0x7e5   :  { %v398_v60 = vsub.f32 %v394_v58, %v397_v59 }
 0x7e7   :  { %482 = vrsqrt.f32 %v398_v60 }
 0x7e8   :  { %v406_v61 = vpop.xlane.xlu1 %405 }
 0x7e9   :  { %v407_v62 = vsub.f32 %v504_v5, %v406_v61 }
 0x7f1   :  { %v483_v63 = vpop.eup %482 }
 0x7f2   :  { %v408_v0 = vmul.f32 %v483_v63, %v407_v62 }
 0x7f4   :  { %v411_v1 = vsel %vm410_vm5, %v408_v0, 0.0 }
 0x7f5   :  { %v412_v2 = vadd.f32 %v411_v1, %v387_v4 }
 0x7f7   :  { %414 = vst [vmem:[#allocation1 + $0x8] sm:$0xff] %v412_v2  ;;  %447 = vst [vmem:[%s547_s1 + $0x8] sm:$0xff] %v412_v2 }

// kernel: custom-call.21
= control target key start
LH: loop header
LB: loop body
LE: loop exit
PB: predicated region body
PF: predicated region fallthrough
CT: control target
= control target key end

     0   :  { %v38_v0 = vlaneseq  ;;  %v276_v9 = vmov -1.0   ;;  %v277_v53 = vmov 0.0   ;;  %s337_s0 = inlined_call_operand.vmem [shape: f32[1,12,12], index: 0, kind: input, shape index: {}]   ;;  %s338_s1 = inlined_call_operand.vmem [shape: f32[1,12,12], index: 1, kind: output, shape index: {}]  }
   0x1   :  { %v31_v1 = vld [vmem:[%s337_s0] sm:$0xff]  ;;  %v33_v36 = vld [vmem:[%s337_s0 + $0x8] sm:$0xff] }
   0x2   :  { %v291_v2 = vand.u32 127, %v38_v0  ;;  %v42_v3 = vshrl.u32 %v38_v0, 7 }
   0x4   :  { %vm44_vm0 = vcmp.eq.s32.totalorder %v42_v3, %v291_v2  ;;  %vm40_vm1 = vcmp.lt.s32.totalorder %v291_v2, 12  ;;  %vm49_vm2 = vcmp.ge.s32.totalorder %v42_v3, %v291_v2  ;;  %vm79_vm4 = vcmp.eq.s32.totalorder %v291_v2, 0 }
   0x5   :  { %v46_v4 = vsel %vm44_vm0, %v31_v1, 0.0  ;;  %vm50_vm3 = vmand %vm49_vm2, %vm40_vm1  ;;  %vm76_vm5 = vcmp.eq.s32.totalorder %v291_v2, %v42_v3  ;;  %v80_v10 = vsel %vm79_vm4, 1.0, %v276_v9  ;;  %vm94_vm6 = vcmp.eq.s32.totalorder %v291_v2, 1 }
   0x6   :  { %47 = vadd.xlane.f32.xlu0 %v46_v4  ;;  %v51_v6 = vsel %vm50_vm3, %v31_v1, 0.0  ;;  %v81_v11 = vsel %vm76_vm5, %v80_v10, 0.0  ;;  %vm104_vm7 = vcmp.eq.s32.totalorder %v291_v2, 2  ;;  %vm114_vm8 = vcmp.eq.s32.totalorder %v291_v2, 3 }
   0x7   :  { %vm124_vm9 = vcmp.eq.s32.totalorder %v291_v2, 4  ;;  %v59_v31 = vadd.s32 8, %v42_v3  ;;  %vm134_vm11 = vcmp.eq.s32.totalorder %v291_v2, 5  ;;  %vm144_vm14 = vcmp.eq.s32.totalorder %v291_v2, 6 }
   0x8   :  { %vm154_vm0 = vcmp.eq.s32.totalorder %v291_v2, 7  ;;  %vm178_vm2 = vcmp.eq.s32.totalorder %v291_v2, 9  ;;  %vm192_vm3 = vcmp.eq.s32.totalorder %v291_v2, 10  ;;  %vm206_vm4 = vcmp.eq.s32.totalorder %v291_v2, 11 }
   0x9   :  { %vm60_vm10 = vcmp.eq.s32.totalorder %v59_v31, %v291_v2  ;;  %vm65_vm12 = vcmp.ge.s32.totalorder %v59_v31, %v291_v2  ;;  %vm87_vm15 = vcmp.eq.s32.totalorder %v291_v2, %v59_v31 }
   0xa   :  { %v62_v37 = vsel %vm60_vm10, %v33_v36, 0.0  ;;  %vm66_vm13 = vmand %vm65_vm12, %vm40_vm1  ;;  %v88_v54 = vsel %vm87_vm15, -1.0, %v277_v53  ;;  %vm164_vm1 = vcmp.eq.s32.totalorder %v291_v2, 8 }
   0xb   :  { %v67_v44 = vsel %vm66_vm13, %v33_v36, 0.0 }
  0x93   :  { %v294_v5 = vpop.xlane.xlu0 %47 }
  0x94   :  { %272 = vrcp.f32 %v294_v5 }
  0x9e   :  { %v301_v7 = vpop.eup %272 }
  0x9f   :  { %v53_v8 = vmul.f32 %v301_v7, %v51_v6 }
  0xa1   :  { %54 = vst [vmem:[#allocation2] sm:$0xff] %v53_v8 }
  0xa8   :  { %v90_v12 = vld [vmem:[#allocation2 + $0x1] ss:$0 sm:$0xff]  ;;  %v100_v15 = vld [vmem:[#allocation2 + $0x2] ss:$0 sm:$0xff]  ;;  %v110_v20 = vld [vmem:[#allocation2 + $0x3] ss:$0 sm:$0xff] }
  0xa9   :  { %v91_v13 = vxor.u32 2147483648, %v90_v12  ;;  %v101_v17 = vxor.u32 2147483648, %v100_v15  ;;  %v111_v22 = vxor.u32 2147483648, %v110_v20  ;;  %v120_v25 = vld [vmem:[#allocation2 + $0x4] ss:$0 sm:$0xff] }
  0xaa   :  { %v121_v27 = vxor.u32 2147483648, %v120_v25  ;;  %v130_v30 = vld [vmem:[#allocation2 + $0x5] ss:$0 sm:$0xff]  ;;  %v140_v38 = vld [vmem:[#allocation2 + $0x6] ss:$0 sm:$0xff] }
  0xab   :  { %v95_v14 = vmul.f32 %v91_v13, %v81_v11  ;;  %v131_v33 = vxor.u32 2147483648, %v130_v30  ;;  %v141_v40 = vxor.u32 2147483648, %v140_v38  ;;  %v150_v47 = vld [vmem:[#allocation2 + $0x7] ss:$0 sm:$0xff] }
  0xac   :  { %v151_v50 = vxor.u32 2147483648, %v150_v47 }
  0xad   :  { %96 = vadd.xlane.f32.xlu0 %v95_v14 }
 0x13a   :  { %v97_v16 = vpop.xlane.xlu0 %96 }
 0x13b   :  { %v98_v18 = vsel %vm94_vm6, %v97_v16, %v81_v11  ;;  %vm217_vm6 = vweird.f32 %v294_v5 }
 0x13c   :  { %v105_v19 = vmul.f32 %v101_v17, %v98_v18 }
 0x13e   :  { %106 = vadd.xlane.f32.xlu1 %v105_v19 }
 0x1cb   :  { %v107_v21 = vpop.xlane.xlu1 %106 }
 0x1cc   :  { %v108_v23 = vsel %vm104_vm7, %v107_v21, %v98_v18 }
 0x1cd   :  { %v115_v24 = vmul.f32 %v111_v22, %v108_v23 }
 0x1cf   :  { %116 = vadd.xlane.f32.xlu1 %v115_v24 }
 0x25c   :  { %v117_v26 = vpop.xlane.xlu1 %116 }
 0x25d   :  { %v118_v28 = vsel %vm114_vm8, %v117_v26, %v108_v23 }
 0x25e   :  { %v125_v29 = vmul.f32 %v121_v27, %v118_v28 }
 0x260   :  { %126 = vadd.xlane.f32.xlu0 %v125_v29 }
 0x2ed   :  { %v127_v32 = vpop.xlane.xlu0 %126 }
 0x2ee   :  { %v128_v34 = vsel %vm124_vm9, %v127_v32, %v118_v28 }
 0x2ef   :  { %v135_v35 = vmul.f32 %v131_v33, %v128_v34 }
 0x2f1   :  { %136 = vadd.xlane.f32.xlu1 %v135_v35 }
 0x2f5   :  { %63 = vadd.xlane.f32.xlu1 %v62_v37 }
 0x37e   :  { %v137_v39 = vpop.xlane.xlu1 %136 }
 0x37f   :  { %v138_v41 = vsel %vm134_vm11, %v137_v39, %v128_v34 }
 0x380   :  { %v145_v42 = vmul.f32 %v141_v40, %v138_v41 }
 0x382   :  { %146 = vadd.xlane.f32.xlu0 %v145_v42  ;;  %v315_v43 = vpop.xlane.xlu1 %63 }
 0x383   :  { %274 = vrcp.f32 %v315_v43  ;;  %vm222_vm5 = vweird.f32 %v315_v43 }
 0x38d   :  { %v275_v45 = vpop.eup %274 }
 0x38e   :  { %v69_v46 = vmul.f32 %v275_v45, %v67_v44 }
 0x390   :  { %70 = vst [vmem:[#allocation2 + $0x8] sm:$0xff] %v69_v46 }
 0x397   :  { %v160_v48 = vld [vmem:[#allocation2 + $0x8] ss:$0 sm:$0xff]  ;;  %v174_v59 = vld [vmem:[#allocation2 + $0x9] ss:$0 sm:$0xff]  ;;  %v188_v4 = vld [vmem:[#allocation2 + $0xa] ss:$0 sm:$0xff] }
 0x398   :  { %v161_v51 = vxor.u32 2147483648, %v160_v48  ;;  %v175_v62 = vxor.u32 2147483648, %v174_v59  ;;  %v189_v9 = vxor.u32 2147483648, %v188_v4  ;;  %v202_v14 = vld [vmem:[#allocation2 + $0xb] ss:$0 sm:$0xff] }
 0x399   :  { %v203_v17 = vxor.u32 2147483648, %v202_v14 }
 0x39a   :  { %v169_v56 = vmul.f32 %v161_v51, %v88_v54 }
 0x40f   :  { %v147_v49 = vpop.xlane.xlu0 %146 }
 0x410   :  { %v148_v52 = vsel %vm144_vm14, %v147_v49, %v138_v41 }
 0x411   :  { %v155_v55 = vmul.f32 %v151_v50, %v148_v52 }
 0x413   :  { %156 = vadd.xlane.f32.xlu0 %v155_v55 }
 0x417   :  { %170 = vadd.xlane.f32.xlu0 %v169_v56 }
 0x4a0   :  { %v157_v57 = vpop.xlane.xlu0 %156 }
 0x4a1   :  { %v158_v58 = vsel %vm154_vm0, %v157_v57, %v148_v52 }
 0x4a2   :  { %v165_v60 = vmul.f32 %v161_v51, %v158_v58 }
 0x4a4   :  { %v171_v61 = vpop.xlane.xlu0 %170  ;;  %166 = vadd.xlane.f32.xlu1 %v165_v60 }
 0x4a5   :  { %v172_v63 = vsel %vm164_vm1, %v171_v61, %v88_v54 }
 0x4a6   :  { %v183_v0 = vmul.f32 %v175_v62, %v172_v63 }
 0x4a8   :  { %184 = vadd.xlane.f32.xlu0 %v183_v0 }
 0x531   :  { %v167_v1 = vpop.xlane.xlu1 %166 }
 0x532   :  { %v168_v3 = vsel %vm164_vm1, %v167_v1, %v158_v58 }
 0x533   :  { %v179_v6 = vmul.f32 %v175_v62, %v168_v3 }
 0x535   :  { %v185_v8 = vpop.xlane.xlu0 %184  ;;  %180 = vadd.xlane.f32.xlu1 %v179_v6 }
 0x536   :  { %v186_v10 = vsel %vm178_vm2, %v185_v8, %v172_v63 }
 0x537   :  { %v197_v11 = vmul.f32 %v189_v9, %v186_v10 }
 0x539   :  { %198 = vadd.xlane.f32.xlu0 %v197_v11 }
 0x5c2   :  { %v181_v12 = vpop.xlane.xlu1 %180 }
 0x5c3   :  { %v182_v13 = vsel %vm178_vm2, %v181_v12, %v168_v3 }
 0x5c4   :  { %v193_v15 = vmul.f32 %v189_v9, %v182_v13 }
 0x5c6   :  { %v199_v16 = vpop.xlane.xlu0 %198  ;;  %194 = vadd.xlane.f32.xlu1 %v193_v15 }
 0x5c7   :  { %v200_v18 = vsel %vm192_vm3, %v199_v16, %v186_v10 }
 0x5c8   :  { %v211_v19 = vmul.f32 %v203_v17, %v200_v18 }
 0x5ca   :  { %212 = vadd.xlane.f32.xlu0 %v211_v19 }
 0x653   :  { %v195_v20 = vpop.xlane.xlu1 %194 }
 0x654   :  { %v196_v21 = vsel %vm192_vm3, %v195_v20, %v182_v13 }
 0x655   :  { %v207_v22 = vmul.f32 %v203_v17, %v196_v21 }
 0x657   :  { %v213_v23 = vpop.xlane.xlu0 %212  ;;  %208 = vadd.xlane.f32.xlu1 %v207_v22 }
 0x658   :  { %v214_v24 = vsel %vm206_vm4, %v213_v23, %v200_v18 }
 0x659   :  { %v221_v25 = vmul.f32 %v275_v45, %v214_v24 }
 0x65b   :  { %v223_v26 = vsel %vm222_vm5, %v214_v24, %v221_v25 }
 0x65c   :  { %258 = vst [vmem:[%s338_s1 + $0x8] sm:$0xff] %v223_v26 }
 0x6e4   :  { %v209_v27 = vpop.xlane.xlu1 %208 }
 0x6e5   :  { %v210_v28 = vsel %vm206_vm4, %v209_v27, %v196_v21 }
 0x6e6   :  { %v216_v29 = vmul.f32 %v301_v7, %v210_v28 }
 0x6e8   :  { %v218_v30 = vsel %vm217_vm6, %v210_v28, %v216_v29 }
 0x6e9   :  { %256 = vst [vmem:[%s338_s1] sm:$0xff] %v218_v30 }

// kernel: imvgcn_forward.1
= control target key start
LH: loop header
LB: loop body
LE: loop exit
PB: predicated region body
PF: predicated region fallthrough
CT: control target
= control target key end

     0   :  { %vm79_vm0 = vcmask 195584   ;;  %vm86_vm1 = vcmask 1043456   ;;  %vm151_vm2 = vcmask 261120   ;;  %vm225_vm3 = vcmask 1045504   ;;  %s1296_s3 = inlined_call_operand.vmem [shape: bf16[24,12], index: 3, kind: input, shape index: {}]   ;;  %s1297_s2 = inlined_call_operand.vmem [shape: bf16[32,24], index: 2, kind: input, shape index: {}]   ;;  %s1298_s1 = inlined_call_operand.vmem [shape: bf16[32,32], index: 1, kind: input, shape index: {}]   ;;  %s1299_s4 = inlined_call_operand.vmem [shape: bf16[12,6], index: 4, kind: input, shape index: {}]   ;;  %s1300_s7 = inlined_call_operand.vmem [shape: bf16[16,8], index: 7, kind: input, shape index: {}]   ;;  %s1301_s6 = inlined_call_operand.vmem [shape: bf16[32,16], index: 6, kind: input, shape index: {}]   ;;  %s1302_s5 = inlined_call_operand.vmem [shape: bf16[32,32], index: 5, kind: input, shape index: {}]   ;;  %s1303_s8 = inlined_call_operand.vmem [shape: bf16[8,4], index: 8, kind: input, shape index: {}]   ;;  %s1304_s12 = inlined_call_operand.vmem [shape: f32[32,6], index: 12, kind: output, shape index: {1}]   ;;  %s1305_s10 = inlined_call_operand.vmem [shape: bf16[4,4], index: 10, kind: input, shape index: {}]   ;;  %s1306_s9 = inlined_call_operand.vmem [shape: bf16[6,4], index: 9, kind: input, shape index: {}]   ;;  %s1307_s13 = inlined_call_operand.vmem [shape: f32[32,4], index: 13, kind: output, shape index: {2}]   ;;  %s1308_s0 = inlined_call_operand.vmem [shape: bf16[32,32], index: 0, kind: input, shape index: {}]   ;;  %s1309_s11 = inlined_call_operand.vmem [shape: f32[32,4], index: 11, kind: output, shape index: {0}]  }
   0x1   :  { %v1021_v0 = vld [vmem:[%s1296_s3] sm:$0xff]   ;;  %v1022_v1 = vld [vmem:[%s1296_s3 + $0x8] ss:$0 sps:$4 sm:$0xff]   ;;  %vm218_vm4 = vcmask 97280   ;;  %vm386_vm5 = vcmask 130048   ;;  %vm333_vm6 = vcmask 48128  }
   0x2   :  { %v1023_v2 = vld [vmem:[%s1297_s2] sm:$0xff]   ;;  %934 = vmatprep.subr.bf16.mxu0 %v1021_v0  ;;  %v88_v3 = vsel %vm86_vm1, %v1022_v1, 0  ;;  %v1024_v4 = vld [vmem:[%s1297_s2 + $0x8] sm:$0xff]   ;;  %vm515_vm7 = vcmask 64512   ;;  %vm660_vm8 = vcmask 1041408   ;;  %vm719_vm9 = vcmask 1042432  }
   0x3   :  { %935 = vmatpush3.bf16.msra.mxu0 %v1021_v0  ;;  %938 = vmatprep.mubr.msk.bf16.mxu0 %vm79_vm0, %v1023_v2  ;;  %v1025_v5 = vld [vmem:[%s1298_s1] sm:$0xff]   ;;  %v1026_v12 = vld [vmem:[%s1298_s1 + $0x8] sm:$0xff]   ;;  %vm629_vm10 = vcmask 31744  }
   0x4   :  { %1016 = vmatprep.subr.msk.bf16.mxu0 %vm86_vm1, %v1022_v1  ;;  %946 = vmatprep.mubr.msk.bf16.mxu1 %vm151_vm2, %v1025_v5  ;;  %v1027_v13 = vld [vmem:[%s1299_s4] sm:$0x3f]   ;;  %v1030_v27 = vld [vmem:[%s1301_s6 + $0x8] sm:$0xff]  }
   0x5   :  { %v227_v14 = vsel %vm225_vm3, %v1027_v13, 0  ;;  %v1028_v15 = vld [vmem:[%s1300_s7] sm:$0xff]   ;;  %v1188_v41 = vld [vmem:[%s1302_s5 + $0x8] sm:$0xff]  }
   0x6   :  { %v1029_v26 = vld [vmem:[%s1301_s6] sm:$0xff]  }
   0x7   :  { %937 = vmatpush3.bf16.msra.mxu0 %v88_v3  ;;  %v1031_v39 = vld [vmem:[%s1302_s5] sm:$0xff]  }
   0x8   :  { %1017 = vmatprep.subr.msk.bf16.mxu0 %vm225_vm3, %v1027_v13  ;;  %v368_v42 = vld [vmem:[%s1303_s8] sm:$0xf] }
   0x9   :  { %v523_v43 = vsel %vm86_vm1, %v368_v42, 0 }
   0xa   :  { %939 = vmatmul.mubr.msk.bf16.vlgmr.msra.gmra.mrb[0].mxu0 %vm79_vm0, %v1024_v4 }
   0xb   :  { %951 = vmatpush3.bf16.msra.mxu0 %v227_v14 }
   0xc   :  { %964 = vmatprep.subr.bf16.mxu0 %v1028_v15 }
  0xdd   :  { %v940_v6 = vpop.f32.mrb[0].mxu0 }
  0xde   :  { %v124_v7 = vpop.f32.mrb[1].mxu0 }
  0xdf   :  { %v941_v8 = vpop.f32.mrb[2].mxu0 }
  0xe0   :  { %v140_v9 = vpack.c.bf16 %v941_v8, %v940_v6  ;;  %v127_v10 = vpop.f32.mrb[3].mxu0 }
  0xe1   :  { %v139_v11 = vpack.c.bf16 %v127_v10, %v124_v7 }
  0xe3   :  { %942 = vmatprep.subr.bf16.mxu1 %v139_v11 }
  0xe4   :  { %943 = vmatpush3.bf16.msra.mxu1 %v139_v11 }
  0xe5   :  { %944 = vmatprep.subr.bf16.mxu1 %v140_v9 }
  0xe8   :  { %945 = vmatpush3.bf16.msra.mxu1 %v140_v9 }
  0xeb   :  { %947 = vmatmul.mubr.msk.bf16.vlgmr.msra.gmra.mrb[0].mxu1 %vm151_vm2, %v1026_v12 }
  0xec   :  { %960 = vmatprep.mubr.msk.bf16.mxu1 %vm151_vm2, %v1025_v5 }
 0x1be   :  { %v948_v16 = vpop.f32.mrb[0].mxu1 }
 0x1bf   :  { %1035 = vtanh.f32 %v948_v16  ;;  %v192_v17 = vpop.f32.mrb[1].mxu1 }
 0x1c0   :  { %1037 = vtanh.f32 %v192_v17  ;;  %v949_v18 = vpop.f32.mrb[2].mxu1 }
 0x1c1   :  { %1039 = vtanh.f32 %v949_v18  ;;  %v195_v19 = vpop.f32.mrb[3].mxu1 }
 0x1c2   :  { %1041 = vtanh.f32 %v195_v19 }
 0x1c9   :  { %v1036_v20 = vpop.eup %1035 }
 0x1ca   :  { %v1038_v21 = vpop.eup %1037 }
 0x1cb   :  { %v1040_v22 = vpop.eup %1039 }
 0x1cc   :  { %v1042_v23 = vpop.eup %1041  ;;  %v212_v24 = vpack.c.bf16 %v1040_v22, %v1036_v20 }
 0x1cd   :  { %v211_v25 = vpack.c.bf16 %v1042_v23, %v1038_v21 }
 0x1cf   :  { %952 = vmatprep.mubr.msk.bf16.mxu0 %vm218_vm4, %v211_v25 }
 0x1d0   :  { %953 = vmatmul.mubr.msk.bf16.vlgmr.msra.gmra.mrb[4].mxu0 %vm218_vm4, %v212_v24  ;;  %v369_v24 = vld [vmem:[%s1305_s10] sm:$0x3] }
 0x1d1   :  { %965 = vmatpush3.bf16.msra.mxu0 %v1028_v15  ;;  %966 = vmatprep.mubr.msk.bf16.mxu0 %vm386_vm5, %v1029_v26  ;;  %v662_v25 = vsel %vm660_vm8, %v369_v24, 0  ;;  %v59_v26 = vld [vmem:[%s1306_s9] sm:$0x7] }
 0x1d2   :  { %1018 = vmatprep.subr.msk.bf16.mxu0 %vm86_vm1, %v368_v42 }
 0x1d8   :  { %967 = vmatmul.mubr.msk.bf16.vlgmr.msra.gmra.mrb[8].mxu0 %vm386_vm5, %v1030_v27  ;;  %v721_v27 = vsel %vm719_vm9, %v59_v26, 0 }
 0x1d9   :  { %979 = vmatpush3.bf16.msra.mxu0 %v523_v43 }
 0x1da   :  { %1019 = vmatprep.subr.msk.bf16.mxu0 %vm660_vm8, %v369_v24 }
 0x2a3   :  { %v954_v28 = vpop.f32.mrb[4].mxu0 }
 0x2a4   :  { %v263_v29 = vpop.f32.mrb[5].mxu0 }
 0x2a5   :  { %v955_v30 = vpop.f32.mrb[6].mxu0 }
 0x2a6   :  { %v279_v31 = vpack.c.bf16 %v955_v30, %v954_v28  ;;  %v266_v32 = vpop.f32.mrb[7].mxu0 }
 0x2a7   :  { %v278_v33 = vpack.c.bf16 %v266_v32, %v263_v29 }
 0x2a9   :  { %956 = vmatprep.subr.bf16.mxu1 %v278_v33 }
 0x2aa   :  { %957 = vmatpush3.bf16.msra.mxu1 %v278_v33 }
 0x2ab   :  { %958 = vmatprep.subr.bf16.mxu1 %v279_v31  ;;  %v968_v34 = vpop.f32.mrb[8].mxu0 }
 0x2ac   :  { %v427_v35 = vpop.f32.mrb[9].mxu0 }
 0x2ad   :  { %v969_v36 = vpop.f32.mrb[10].mxu0 }
 0x2ae   :  { %v443_v37 = vpack.c.bf16 %v969_v36, %v968_v34  ;;  %959 = vmatpush3.bf16.msra.mxu1 %v279_v31  ;;  %v430_v38 = vpop.f32.mrb[11].mxu0 }
 0x2af   :  { %v442_v40 = vpack.c.bf16 %v430_v38, %v427_v35 }
 0x2b1   :  { %961 = vmatmul.mubr.msk.bf16.vlgmr.msra.gmra.mrb[4].mxu1 %vm151_vm2, %v1026_v12  ;;  %970 = vmatprep.subr.bf16.mxu1 %v442_v40 }
 0x2b2   :  { %971 = vmatpush3.bf16.msra.mxu1 %v442_v40  ;;  %974 = vmatprep.mubr.msk.bf16.mxu1 %vm151_vm2, %v1031_v39 }
 0x2b3   :  { %972 = vmatprep.subr.bf16.mxu1 %v443_v37 }
 0x2b6   :  { %973 = vmatpush3.bf16.msra.mxu1 %v443_v37 }
 0x2b9   :  { %975 = vmatmul.mubr.msk.bf16.vlgmr.msra.gmra.mrb[8].mxu1 %vm151_vm2, %v1188_v41 }
 0x2ba   :  { %988 = vmatprep.mubr.msk.bf16.mxu1 %vm151_vm2, %v1031_v39 }
 0x384   :  { %v962_v44 = vpop.f32.mrb[4].mxu1 }
 0x385   :  { %v314_v45 = vpop.f32.mrb[5].mxu1 }
 0x386   :  { %1043 = vtanh.f32 %v314_v45  ;;  %v963_v46 = vpop.f32.mrb[6].mxu1 }
 0x387   :  { %1045 = vtanh.f32 %v962_v44  ;;  %v317_v47 = vpop.f32.mrb[7].mxu1 }
 0x388   :  { %1047 = vtanh.f32 %v317_v47 }
 0x389   :  { %1049 = vtanh.f32 %v963_v46 }
 0x38c   :  { %v976_v48 = vpop.f32.mrb[8].mxu1 }
 0x38d   :  { %1051 = vtanh.f32 %v976_v48  ;;  %v494_v49 = vpop.f32.mrb[9].mxu1 }
 0x38e   :  { %1053 = vtanh.f32 %v494_v49  ;;  %v977_v50 = vpop.f32.mrb[10].mxu1 }
 0x38f   :  { %1055 = vtanh.f32 %v977_v50  ;;  %v497_v51 = vpop.f32.mrb[11].mxu1 }
 0x390   :  { %v1044_v52 = vpop.eup %1043  ;;  %1057 = vtanh.f32 %v497_v51 }
 0x391   :  { %v1046_v53 = vpop.eup %1045  ;;  %v334_v55 = vsel %vm333_vm6, %v1044_v52, 0.0 }
 0x392   :  { %v1048_v54 = vpop.eup %1047  ;;  %v337_v59 = vsel %vm333_vm6, %v1046_v53, 0.0 }
 0x393   :  { %v335_v56 = vsel %vm333_vm6, %v1048_v54, 0.0  ;;  %v1050_v57 = vpop.eup %1049 }
 0x394   :  { %v336_v58 = vadd.f32 %v335_v56, %v334_v55  ;;  %v339_v62 = vsel %vm333_vm6, %v1050_v57, 0.0  ;;  %v1033_v56 = vld [vmem:[%s1308_s0] sm:$0xff]  }
 0x396   :  { %v338_v60 = vadd.f32 %v337_v59, %v336_v58 }
 0x397   :  { %v1052_v61 = vpop.eup %1051 }
 0x398   :  { %v1054_v63 = vpop.eup %1053  ;;  %v340_v0 = vadd.f32 %v339_v62, %v338_v60 }
 0x399   :  { %v1056_v1 = vpop.eup %1055 }
 0x39a   :  { %v1058_v2 = vpop.eup %1057  ;;  %v341_v3 = vrot.slane %v340_v0, 4  ;;  %v514_v4 = vpack.c.bf16 %v1056_v1, %v1052_v61 }
 0x39b   :  { %v513_v5 = vpack.c.bf16 %v1058_v2, %v1054_v63  ;;  %v1034_v63 = vld [vmem:[%s1308_s0 + $0x8] sm:$0xff]  }
 0x39c   :  { %v342_v6 = vadd.f32 %v341_v3, %v340_v0 }
 0x39d   :  { %980 = vmatprep.mubr.msk.bf16.mxu0 %vm515_vm7, %v513_v5 }
 0x39e   :  { %v343_v7 = vrot.slane %v342_v6, 2  ;;  %981 = vmatmul.mubr.msk.bf16.vlgmr.msra.gmra.mrb[12].mxu0 %vm515_vm7, %v514_v4 }
 0x39f   :  { %993 = vmatpush3.bf16.msra.mxu0 %v662_v25 }
 0x3a0   :  { %v344_v8 = vadd.f32 %v343_v7, %v342_v6  ;;  %1020 = vmatprep.subr.msk.bf16.mxu0 %vm719_vm9, %v59_v26 }
 0x3a2   :  { %v345_v9 = vrot.slane %v344_v8, 1 }
 0x3a4   :  { %v346_v10 = vadd.f32 %v345_v9, %v344_v8 }
 0x3a6   :  { %v347_v11 = vmul.f32 0.03125, %v346_v10 }
 0x3a8   :  { %v1202_v12 = vsub.f32 %v1044_v52, %v347_v11  ;;  %v1204_v13 = vsub.f32 %v1048_v54, %v347_v11  ;;  %v1206_v14 = vsub.f32 %v1046_v53, %v347_v11  ;;  %v1208_v15 = vsub.f32 %v1050_v57, %v347_v11 }
 0x3aa   :  { %352 = vst.msk [vmem:[%s1304_s12] sm:$0xff] %vm333_vm6, %v1202_v12  ;;  %353 = vst.msk [vmem:[%s1304_s12 + $0x8] sm:$0xff] %vm333_vm6, %v1204_v13  ;;  %v356_v16 = vpack.c.bf16 %v1204_v13, %v1202_v12  ;;  %v357_v17 = vpack.c.bf16 %v1208_v15, %v1206_v14 }
 0x3ab   :  { %354 = vst.msk [vmem:[%s1304_s12 + $0x10] sm:$0xff] %vm333_vm6, %v1206_v14  ;;  %355 = vst.msk [vmem:[%s1304_s12 + $0x18] sm:$0xff] %vm333_vm6, %v1208_v15 }
 0x471   :  { %v982_v18 = vpop.f32.mrb[12].mxu0 }
 0x472   :  { %v559_v19 = vpop.f32.mrb[13].mxu0 }
 0x473   :  { %v983_v20 = vpop.f32.mrb[14].mxu0 }
 0x474   :  { %v575_v21 = vpack.c.bf16 %v983_v20, %v982_v18  ;;  %v562_v22 = vpop.f32.mrb[15].mxu0 }
 0x475   :  { %v574_v23 = vpack.c.bf16 %v562_v22, %v559_v19 }
 0x477   :  { %984 = vmatprep.subr.bf16.mxu1 %v574_v23 }
 0x478   :  { %985 = vmatpush3.bf16.msra.mxu1 %v574_v23 }
 0x479   :  { %986 = vmatprep.subr.bf16.mxu1 %v575_v21 }
 0x47c   :  { %987 = vmatpush3.bf16.msra.mxu1 %v575_v21 }
 0x47f   :  { %989 = vmatmul.mubr.msk.bf16.vlgmr.msra.gmra.mrb[12].mxu1 %vm151_vm2, %v1188_v41 }
 0x480   :  { %1008 = vmatprep.mubr.msk.bf16.mxu1 %vm151_vm2, %v1033_v56 }
 0x552   :  { %v990_v28 = vpop.f32.mrb[12].mxu1 }
 0x553   :  { %v610_v29 = vpop.f32.mrb[13].mxu1 }
 0x554   :  { %1059 = vtanh.f32 %v610_v29  ;;  %v991_v30 = vpop.f32.mrb[14].mxu1 }
 0x555   :  { %1061 = vtanh.f32 %v990_v28  ;;  %v613_v31 = vpop.f32.mrb[15].mxu1 }
 0x556   :  { %1063 = vtanh.f32 %v613_v31 }
 0x557   :  { %1065 = vtanh.f32 %v991_v30 }
 0x55e   :  { %v1060_v32 = vpop.eup %1059 }
 0x55f   :  { %v1062_v33 = vpop.eup %1061  ;;  %v630_v35 = vsel %vm629_vm10, %v1060_v32, 0.0 }
 0x560   :  { %v1064_v34 = vpop.eup %1063  ;;  %v633_v39 = vsel %vm629_vm10, %v1062_v33, 0.0 }
 0x561   :  { %v631_v36 = vsel %vm629_vm10, %v1064_v34, 0.0  ;;  %v1066_v37 = vpop.eup %1065 }
 0x562   :  { %v632_v38 = vadd.f32 %v631_v36, %v630_v35  ;;  %v635_v41 = vsel %vm629_vm10, %v1066_v37, 0.0 }
 0x564   :  { %v634_v40 = vadd.f32 %v633_v39, %v632_v38 }
 0x566   :  { %v636_v42 = vadd.f32 %v635_v41, %v634_v40 }
 0x568   :  { %v637_v43 = vrot.slane %v636_v42, 4 }
 0x56a   :  { %v638_v44 = vadd.f32 %v637_v43, %v636_v42 }
 0x56c   :  { %v639_v45 = vrot.slane %v638_v44, 2 }
 0x56e   :  { %v640_v46 = vadd.f32 %v639_v45, %v638_v44 }
 0x570   :  { %v641_v47 = vrot.slane %v640_v46, 1 }
 0x572   :  { %v642_v48 = vadd.f32 %v641_v47, %v640_v46 }
 0x574   :  { %v643_v49 = vmul.f32 0.03125, %v642_v48 }
 0x576   :  { %v644_v50 = vsub.f32 %v1060_v32, %v643_v49  ;;  %v645_v51 = vsub.f32 %v1064_v34, %v643_v49  ;;  %v646_v52 = vsub.f32 %v1062_v33, %v643_v49  ;;  %v647_v53 = vsub.f32 %v1066_v37, %v643_v49 }
 0x578   :  { %648 = vst.msk [vmem:[%s1307_s13] sm:$0xff] %vm629_vm10, %v644_v50  ;;  %649 = vst.msk [vmem:[%s1307_s13 + $0x8] sm:$0xff] %vm629_vm10, %v645_v51  ;;  %v652_v54 = vpack.c.bf16 %v645_v51, %v644_v50  ;;  %v653_v55 = vpack.c.bf16 %v647_v53, %v646_v52 }
 0x579   :  { %650 = vst.msk [vmem:[%s1307_s13 + $0x10] sm:$0xff] %vm629_vm10, %v646_v52  ;;  %651 = vst.msk [vmem:[%s1307_s13 + $0x18] sm:$0xff] %vm629_vm10, %v647_v53 }
 0x57a   :  { %994 = vmatprep.mubr.msk.bf16.mxu0 %vm629_vm10, %v652_v54 }
 0x57b   :  { %995 = vmatmul.mubr.msk.bf16.vlgmr.msra.gmra.mrb[16].mxu0 %vm629_vm10, %v653_v55 }
 0x57c   :  { %999 = vmatpush3.bf16.msra.mxu0 %v721_v27  ;;  %1000 = vmatprep.mubr.msk.bf16.mxu0 %vm333_vm6, %v356_v16 }
 0x587   :  { %1001 = vmatmul.mubr.msk.bf16.vlgmr.msra.gmra.mrb[16].mxu0 %vm333_vm6, %v357_v17 }
 0x65a   :  { %v1002_v57 = vpop.f32.mrb[16].mxu0 }
 0x65b   :  { %v757_v58 = vpop.f32.mrb[17].mxu0 }
 0x65c   :  { %v1003_v59 = vpop.f32.mrb[18].mxu0 }
 0x65d   :  { %v773_v60 = vpack.c.bf16 %v1003_v59, %v1002_v57  ;;  %v760_v61 = vpop.f32.mrb[19].mxu0 }
 0x65e   :  { %v772_v62 = vpack.c.bf16 %v760_v61, %v757_v58 }
 0x660   :  { %1004 = vmatprep.subr.bf16.mxu1 %v772_v62 }
 0x661   :  { %1005 = vmatpush3.bf16.msra.mxu1 %v772_v62 }
 0x662   :  { %1006 = vmatprep.subr.bf16.mxu1 %v773_v60 }
 0x665   :  { %1007 = vmatpush3.bf16.msra.mxu1 %v773_v60 }
 0x668   :  { %1009 = vmatmul.mubr.msk.bf16.vlgmr.msra.gmra.mrb[16].mxu1 %vm151_vm2, %v1034_v63 }
 0x73b   :  { %v1010_v0 = vpop.f32.mrb[16].mxu1 }
 0x73c   :  { %1067 = vtanh.f32 %v1010_v0  ;;  %v824_v1 = vpop.f32.mrb[17].mxu1 }
 0x73d   :  { %1069 = vtanh.f32 %v824_v1  ;;  %v1011_v2 = vpop.f32.mrb[18].mxu1 }
 0x73e   :  { %1071 = vtanh.f32 %v1011_v2  ;;  %v827_v3 = vpop.f32.mrb[19].mxu1 }
 0x73f   :  { %1073 = vtanh.f32 %v827_v3 }
 0x746   :  { %v1068_v4 = vpop.eup %1067 }
 0x747   :  { %v1070_v5 = vpop.eup %1069  ;;  %845 = vst.msk [vmem:[%s1309_s11 + $0x10] sm:$0xff] %vm629_vm10, %v1068_v4 }
 0x748   :  { %v1072_v6 = vpop.eup %1071  ;;  %843 = vst.msk [vmem:[%s1309_s11] sm:$0xff] %vm629_vm10, %v1070_v5 }
 0x749   :  { %v1074_v7 = vpop.eup %1073  ;;  %846 = vst.msk [vmem:[%s1309_s11 + $0x18] sm:$0xff] %vm629_vm10, %v1072_v6 }
 0x74a   :  { %844 = vst.msk [vmem:[%s1309_s11 + $0x8] sm:$0xff] %vm629_vm10, %v1074_v7 }

</bundles_post_ra>
